<compile_context>
chip_gen: v7x
topology: tpu7x:2x2x1
jax: 0.10.0
libtpu: 0.0.40
codegen_flags: <defaults>
</compile_context>

<pallas_src>
import functools

import jax
import jax.numpy as jnp
from jax.experimental import pallas as pl
from jax.experimental.pallas import tpu as pltpu


# ----------------------------------------------------------------------------
# Fused depthwise3x3 + BN + ReLU  ->  pointwise1x1 + BN + ReLU   (one kernel)
# ----------------------------------------------------------------------------

def _fused_dsconv_kernel(x_ref, dw_w_ref, dw_shift_ref, pw_w_ref, pw_shift_ref, o_ref,
                         *, k, stride, mult):
    """One (batch, output-row-tile) block.

    x_ref:        (1, in_rows, Wp, Cin)  bf16  halo'd padded input window
    dw_w_ref:     (k*k, Cout)            f32   depthwise taps, BN scale folded,
                                               permuted channel order c' = r*Cin + g
    dw_shift_ref: (1, Cout)              f32   folded BN shift (same permuted order)
    pw_w_ref:     (Cout, Cout)           bf16  pointwise weight, BN scale folded into
                                               columns, rows permuted to match dw order
    pw_shift_ref: (1, Cout)              f32   folded BN shift (natural order)
    o_ref:        (1, th, Wo, Cout)      f32   final output tile (natural channel order)
    """
    _, th, wo, cout = o_ref.shape
    s = stride

    # Load the bf16 window once; replicate lanes once so every tap FMA is Cout wide
    # (full 128-lane vregs even when Cin < 128, e.g. MobileNet's early layers).
    xv = x_ref[...]                                     # (1, in_rows, Wp, Cin) bf16
    if mult > 1:
        xv = jnp.concatenate([xv] * mult, axis=-1)      # (1, in_rows, Wp, Cout) bf16

    dw_w = dw_w_ref[...]                                # (k*k, Cout) f32
    dw_shift = dw_shift_ref[...].reshape(1, 1, 1, cout)

    # Depthwise 3x3: one live f32 tap at a time, f32 accumulator.
    acc = jnp.zeros((1, th, wo, cout), jnp.float32)
    for ki in range(k):
        for kj in range(k):
            tap = xv[:, ki:ki + (th - 1) * s + 1:s, kj:kj + (wo - 1) * s + 1:s, :]
            w_t = dw_w[ki * k + kj:ki * k + kj + 1].reshape(1, 1, 1, cout)
            acc = acc + tap.astype(jnp.float32) * w_t

    y = jnp.maximum(acc + dw_shift, 0.0)                # depthwise BN(shift) + ReLU
    y = y.astype(jnp.bfloat16).reshape(th * wo, cout)   # -> MXU operand

    # Fused pointwise 1x1: bf16 x bf16 MXU matmul with f32 accumulation.
    z = jnp.dot(y, pw_w_ref[...], preferred_element_type=jnp.float32)
    z = jnp.maximum(z + pw_shift_ref[...], 0.0)         # pointwise BN(shift) + ReLU
    o_ref[...] = z.reshape(1, th, wo, cout).astype(o_ref.dtype)


def _vmem_estimate(th, *, s, k, wp, wo, cin, cout, mult):
    """Rough per-grid-step VMEM bytes (double-buffered tiles + intermediates + weights)."""
    in_rows = (th - 1) * s + k
    in_b = in_rows * wp * cin * 2                       # bf16 input tile
    rep_b = in_rows * wp * cout * 2 if mult > 1 else 0  # lane-replicated bf16 copy
    out_b = th * wo * cout * 4                          # f32 output tile
    inter = th * wo * cout * (4 + 4 + 2)                # f32 acc + f32 tap + bf16 y
    resident = k * k * cout * 4 + cout * cout * 2 + 2 * cout * 4
    return 2 * (in_b + out_b) + rep_b + inter + resident


def fused_dsconv(x_nhwc, dw_w, dw_shift, pw_w, pw_shift, *, kernel_size, stride, padding, mult):
    """relu(pw(relu(dw(x)*?+shift))*?+shift), all folded; x_nhwc bf16 -> f32 NHWC output."""
    n, h, w, cin = x_nhwc.shape
    cout = pw_w.shape[1]
    k, s, p = kernel_size, stride, padding
    ho = (h + 2 * p - k) // s + 1
    wo = (w + 2 * p - k) // s + 1
    wp = w + 2 * p

    est = functools.partial(_vmem_estimate, s=s, k=k, wp=wp, wo=wo, cin=cin, cout=cout, mult=mult)
    budget = 12 << 20                                   # conservative across v5e/v6e/v7x
    if est(ho) <= budget:
        th = ho                                         # whole image per grid step
    else:
        th = min(32, ho)
        while th > 1 and est(th) > budget:
            th -= 1
    n_row_tiles = -(-ho // th)
    ho_pad = n_row_tiles * th                           # padded/sliced tail for awkward Ho
    in_rows = (th - 1) * s + k
    rows_needed = (ho_pad - 1) * s + k

    # Zero-pad (conv padding + any extra bottom rows the tail tile needs).
    bot = max(p, rows_needed - (h + p))
    xp = jnp.pad(x_nhwc, ((0, 0), (p, bot), (p, p), (0, 0)))

    if n_row_tiles == 1:
        x_spec = pl.BlockSpec((1, in_rows, wp, cin), lambda b, i: (b, 0, 0, 0))
    else:
        # Halo'd overlapping window: element-offset indexing on the H dim only.
        x_spec = pl.BlockSpec((1, pl.Element(in_rows), wp, cin),
                              lambda b, i: (b, i * th * s, 0, 0))

    kern = functools.partial(_fused_dsconv_kernel, k=k, stride=s, mult=mult)
    out = pl.pallas_call(
        kern,
        out_shape=jax.ShapeDtypeStruct((n, ho_pad, wo, cout), jnp.float32),
        grid=(n, n_row_tiles),
        in_specs=[
            x_spec,
            pl.BlockSpec((k * k, cout), lambda b, i: (0, 0)),     # resident weights
            pl.BlockSpec((1, cout), lambda b, i: (0, 0)),
            pl.BlockSpec((cout, cout), lambda b, i: (0, 0)),      # resident pw weights
            pl.BlockSpec((1, cout), lambda b, i: (0, 0)),
        ],
        out_specs=pl.BlockSpec((1, th, wo, cout), lambda b, i: (b, i, 0, 0)),
        compiler_params=pltpu.CompilerParams(
            dimension_semantics=("parallel", "parallel"),
            vmem_limit_bytes=32 * 1024 * 1024),
    )(xp, dw_w, dw_shift, pw_w, pw_shift)

    if ho_pad != ho:
        out = out[:, :ho]
    return out


# ----------------------------------------------------------------------------
# Parameter setup (inference BN folded into weights/shift) and module forward
# ----------------------------------------------------------------------------

def _fold_bn(key, c, eps=1e-5):
    k1, k2, k3, k4 = jax.random.split(key, 4)
    gamma = 1.0 + 0.1 * jax.random.normal(k1, (c,), jnp.float32)
    beta = 0.1 * jax.random.normal(k2, (c,), jnp.float32)
    mean = 0.1 * jax.random.normal(k3, (c,), jnp.float32)
    var = 1.0 + 0.1 * jax.random.uniform(k4, (c,), jnp.float32)
    scale = gamma / jnp.sqrt(var + eps)
    shift = beta - mean * scale
    return scale, shift


def init_params(key, in_features, out_features, kernel_size=3):
    assert out_features % in_features == 0, "depthwise conv needs out_features % in_features == 0"
    mult = out_features // in_features
    k = kernel_size
    k_dw, k_bn1, k_pw, k_bn2 = jax.random.split(key, 4)

    # Natural (PyTorch) ordering: depthwise output channel o reads input channel o // mult.
    dw_w = jax.random.normal(k_dw, (k, k, out_features), jnp.float32) * (2.0 / (k * k)) ** 0.5
    dw_scale, dw_shift = _fold_bn(k_bn1, out_features)
    pw_w = jax.random.normal(k_pw, (out_features, out_features), jnp.float32) * (2.0 / out_features) ** 0.5
    pw_scale, pw_shift = _fold_bn(k_bn2, out_features)

    # Kernel channel permutation: kernel channel c' = r*Cin + g  <->  natural channel g*mult + r.
    perm = (jnp.arange(in_features)[None, :] * mult + jnp.arange(mult)[:, None]).reshape(-1)

    # Fold the BN scale into the conv weights (natural order), then permute for the kernel.
    dw_w_folded = dw_w.reshape(k * k, out_features) * dw_scale[None, :]
    pw_w_folded = pw_w * pw_scale[None, :]

    return {
        "kernel_size": k,
        "multiplier": mult,
        # kernel operands
        "dw_w": dw_w_folded[:, perm],                          # (k*k, Cout) f32
        "dw_shift": dw_shift[perm].reshape(1, -1),             # (1, Cout)   f32
        "pw_w": pw_w_folded[perm, :].astype(jnp.bfloat16),     # (Cout, Cout) bf16
        "pw_shift": pw_shift.reshape(1, -1),                   # (1, Cout)   f32
        # natural-order copies for the pure-JAX reference
        "ref": {"dw_w": dw_w, "dw_scale": dw_scale, "dw_shift": dw_shift,
                "pw_w": pw_w, "pw_scale": pw_scale, "pw_shift": pw_shift},
    }


def depthwise_separable_conv_forward(params, x_nchw, *, stride=1, padding=1):
    k = params["kernel_size"]
    # NCHW (PyTorch) -> NHWC at the module boundary; activations bf16 inside.
    x = jnp.transpose(x_nchw, (0, 2, 3, 1)).astype(jnp.bfloat16)
    z = fused_dsconv(x, params["dw_w"], params["dw_shift"], params["pw_w"], params["pw_shift"],
                     kernel_size=k, stride=stride, padding=padding, mult=params["multiplier"])
    return jnp.transpose(z, (0, 3, 1, 2))                      # back to NCHW, f32


# ----------------------------------------------------------------------------
# Pure-JAX reference (same bf16 quantization points as the kernel path)
# ----------------------------------------------------------------------------

def reference_forward(params, x_nchw, *, stride=1, padding=1):
    r = params["ref"]
    k = params["kernel_size"]
    cin = x_nchw.shape[1]
    cout = r["dw_w"].shape[-1]
    hi = jax.lax.Precision.HIGHEST

    x = jnp.transpose(x_nchw, (0, 2, 3, 1)).astype(jnp.bfloat16).astype(jnp.float32)
    dw_w = r["dw_w"].reshape(k, k, 1, cout)
    y = jax.lax.conv_general_dilated(
        x, dw_w, (stride, stride), [(padding, padding)] * 2,
        dimension_numbers=("NHWC", "HWIO", "NHWC"),
        feature_group_count=cin, precision=hi)
    y = jnp.maximum(y * r["dw_scale"] + r["dw_shift"], 0.0)
    y = y.astype(jnp.bfloat16).astype(jnp.float32)

    pw = (r["pw_w"] * r["pw_scale"][None, :]).astype(jnp.bfloat16).astype(jnp.float32)
    z = jnp.einsum("nhwc,cd->nhwd", y, pw, precision=hi) + r["pw_shift"]
    z = jnp.maximum(z, 0.0)
    return jnp.transpose(z, (0, 3, 1, 2))


if __name__ == "__main__":
    key = jax.random.PRNGKey(0)
    k_params, k_x = jax.random.split(key)

    batch, hw = 2, 16
    in_features, out_features = 64, 128               # depthwise channel multiplier = 2
    params = init_params(k_params, in_features, out_features, kernel_size=3)
    x = jax.random.normal(k_x, (batch, in_features, hw, hw), jnp.float32)   # NCHW input

    out = depthwise_separable_conv_forward(params, x, stride=1, padding=1)
    out = jax.block_until_ready(out)

    assert out.shape == (batch, out_features, hw, hw), out.shape
    assert bool(jnp.all(jnp.isfinite(out)))

    ref = reference_forward(params, x, stride=1, padding=1)
    assert bool(jnp.allclose(out, ref, atol=2e-2, rtol=2e-2)), \
        float(jnp.max(jnp.abs(out - ref)))

    print("KERNEL_OK")
</pallas_src>

<mosaic_0001>
module attributes {stable_mosaic.version = 11 : i64} {
  func.func @_fused_dsconv_kernel(%arg0: i32, %arg1: i32, %arg2: memref<1x18x18x64xbf16, #tpu.memory_space<vmem>>, %arg3: memref<9x128xf32, #tpu.memory_space<vmem>>, %arg4: memref<1x128xf32, #tpu.memory_space<vmem>>, %arg5: memref<128x128xbf16, #tpu.memory_space<vmem>>, %arg6: memref<1x128xf32, #tpu.memory_space<vmem>>, %arg7: memref<1x16x16x128xf32, #tpu.memory_space<vmem>>) attributes {dimension_semantics = [#tpu.dimension_semantics<parallel>, #tpu.dimension_semantics<parallel>], iteration_bounds = array<i64: 2, 1>, scalar_prefetch = 0 : i64, scratch_operands = 0 : i64, tpu.core_type = #tpu.core_type<tc>, window_params = [{transform_indices = @transform_0, window_bounds = array<i64: 1, 18, 18, 64>}, {pipeline_mode = #tpu.pipeline_mode<synchronous>, transform_indices = @transform_1, window_bounds = array<i64: 9, 128>}, {pipeline_mode = #tpu.pipeline_mode<synchronous>, transform_indices = @transform_2, window_bounds = array<i64: 1, 128>}, {pipeline_mode = #tpu.pipeline_mode<synchronous>, transform_indices = @transform_3, window_bounds = array<i64: 128, 128>}, {pipeline_mode = #tpu.pipeline_mode<synchronous>, transform_indices = @transform_4, window_bounds = array<i64: 1, 128>}, {transform_indices = @transform_5, window_bounds = array<i64: 1, 16, 16, 128>}]} {
    %c0 = arith.constant 0 : index
    %c0_0 = arith.constant 0 : index
    %c0_1 = arith.constant 0 : index
    %c0_2 = arith.constant 0 : index
    %0 = vector.load %arg2[%c0, %c0_0, %c0_1, %c0_2] : memref<1x18x18x64xbf16, #tpu.memory_space<vmem>>, vector<1x18x18x64xbf16>
    %1 = tpu.concatenate %0, %0 in 3 : vector<1x18x18x64xbf16>, vector<1x18x18x64xbf16> -> vector<1x18x18x128xbf16>
    %c0_3 = arith.constant 0 : index
    %c0_4 = arith.constant 0 : index
    %2 = vector.load %arg3[%c0_3, %c0_4] : memref<9x128xf32, #tpu.memory_space<vmem>>, vector<9x128xf32>
    %c0_5 = arith.constant 0 : index
    %c0_6 = arith.constant 0 : index
    %3 = vector.load %arg4[%c0_5, %c0_6] : memref<1x128xf32, #tpu.memory_space<vmem>>, vector<1x128xf32>
    %4 = vector.shape_cast %3 : vector<1x128xf32> to vector<1x1x1x128xf32>
    %cst = arith.constant 0.000000e+00 : f32
    %5 = vector.broadcast %cst : f32 to vector<1x16x16x128xf32>
    %6 = vector.extract_strided_slice %1 {offsets = [0, 0, 0, 0], sizes = [1, 16, 16, 128], strides = [1, 1, 1, 1]} : vector<1x18x18x128xbf16> to vector<1x16x16x128xbf16>
    %7 = vector.extract_strided_slice %2 {offsets = [0, 0], sizes = [1, 128], strides = [1, 1]} : vector<9x128xf32> to vector<1x128xf32>
    %8 = vector.shape_cast %7 : vector<1x128xf32> to vector<1x1x1x128xf32>
    %9 = arith.extf %6 : vector<1x16x16x128xbf16> to vector<1x16x16x128xf32>
    %10 = vector.broadcast %8 : vector<1x1x1x128xf32> to vector<1x16x16x128xf32>
    %11 = arith.mulf %9, %10 : vector<1x16x16x128xf32>
    %12 = arith.addf %5, %11 : vector<1x16x16x128xf32>
    %13 = vector.extract_strided_slice %1 {offsets = [0, 0, 1, 0], sizes = [1, 16, 16, 128], strides = [1, 1, 1, 1]} : vector<1x18x18x128xbf16> to vector<1x16x16x128xbf16>
    %14 = vector.extract_strided_slice %2 {offsets = [1, 0], sizes = [1, 128], strides = [1, 1]} : vector<9x128xf32> to vector<1x128xf32>
    %15 = vector.shape_cast %14 : vector<1x128xf32> to vector<1x1x1x128xf32>
    %16 = arith.extf %13 : vector<1x16x16x128xbf16> to vector<1x16x16x128xf32>
    %17 = vector.broadcast %15 : vector<1x1x1x128xf32> to vector<1x16x16x128xf32>
    %18 = arith.mulf %16, %17 : vector<1x16x16x128xf32>
    %19 = arith.addf %12, %18 : vector<1x16x16x128xf32>
    %20 = vector.extract_strided_slice %1 {offsets = [0, 0, 2, 0], sizes = [1, 16, 16, 128], strides = [1, 1, 1, 1]} : vector<1x18x18x128xbf16> to vector<1x16x16x128xbf16>
    %21 = vector.extract_strided_slice %2 {offsets = [2, 0], sizes = [1, 128], strides = [1, 1]} : vector<9x128xf32> to vector<1x128xf32>
    %22 = vector.shape_cast %21 : vector<1x128xf32> to vector<1x1x1x128xf32>
    %23 = arith.extf %20 : vector<1x16x16x128xbf16> to vector<1x16x16x128xf32>
    %24 = vector.broadcast %22 : vector<1x1x1x128xf32> to vector<1x16x16x128xf32>
    %25 = arith.mulf %23, %24 : vector<1x16x16x128xf32>
    %26 = arith.addf %19, %25 : vector<1x16x16x128xf32>
    %27 = vector.extract_strided_slice %1 {offsets = [0, 1, 0, 0], sizes = [1, 16, 16, 128], strides = [1, 1, 1, 1]} : vector<1x18x18x128xbf16> to vector<1x16x16x128xbf16>
    %28 = vector.extract_strided_slice %2 {offsets = [3, 0], sizes = [1, 128], strides = [1, 1]} : vector<9x128xf32> to vector<1x128xf32>
    %29 = vector.shape_cast %28 : vector<1x128xf32> to vector<1x1x1x128xf32>
    %30 = arith.extf %27 : vector<1x16x16x128xbf16> to vector<1x16x16x128xf32>
    %31 = vector.broadcast %29 : vector<1x1x1x128xf32> to vector<1x16x16x128xf32>
    %32 = arith.mulf %30, %31 : vector<1x16x16x128xf32>
    %33 = arith.addf %26, %32 : vector<1x16x16x128xf32>
    %34 = vector.extract_strided_slice %1 {offsets = [0, 1, 1, 0], sizes = [1, 16, 16, 128], strides = [1, 1, 1, 1]} : vector<1x18x18x128xbf16> to vector<1x16x16x128xbf16>
    %35 = vector.extract_strided_slice %2 {offsets = [4, 0], sizes = [1, 128], strides = [1, 1]} : vector<9x128xf32> to vector<1x128xf32>
    %36 = vector.shape_cast %35 : vector<1x128xf32> to vector<1x1x1x128xf32>
    %37 = arith.extf %34 : vector<1x16x16x128xbf16> to vector<1x16x16x128xf32>
    %38 = vector.broadcast %36 : vector<1x1x1x128xf32> to vector<1x16x16x128xf32>
    %39 = arith.mulf %37, %38 : vector<1x16x16x128xf32>
    %40 = arith.addf %33, %39 : vector<1x16x16x128xf32>
    %41 = vector.extract_strided_slice %1 {offsets = [0, 1, 2, 0], sizes = [1, 16, 16, 128], strides = [1, 1, 1, 1]} : vector<1x18x18x128xbf16> to vector<1x16x16x128xbf16>
    %42 = vector.extract_strided_slice %2 {offsets = [5, 0], sizes = [1, 128], strides = [1, 1]} : vector<9x128xf32> to vector<1x128xf32>
    %43 = vector.shape_cast %42 : vector<1x128xf32> to vector<1x1x1x128xf32>
    %44 = arith.extf %41 : vector<1x16x16x128xbf16> to vector<1x16x16x128xf32>
    %45 = vector.broadcast %43 : vector<1x1x1x128xf32> to vector<1x16x16x128xf32>
    %46 = arith.mulf %44, %45 : vector<1x16x16x128xf32>
    %47 = arith.addf %40, %46 : vector<1x16x16x128xf32>
    %48 = vector.extract_strided_slice %1 {offsets = [0, 2, 0, 0], sizes = [1, 16, 16, 128], strides = [1, 1, 1, 1]} : vector<1x18x18x128xbf16> to vector<1x16x16x128xbf16>
    %49 = vector.extract_strided_slice %2 {offsets = [6, 0], sizes = [1, 128], strides = [1, 1]} : vector<9x128xf32> to vector<1x128xf32>
    %50 = vector.shape_cast %49 : vector<1x128xf32> to vector<1x1x1x128xf32>
    %51 = arith.extf %48 : vector<1x16x16x128xbf16> to vector<1x16x16x128xf32>
    %52 = vector.broadcast %50 : vector<1x1x1x128xf32> to vector<1x16x16x128xf32>
    %53 = arith.mulf %51, %52 : vector<1x16x16x128xf32>
    %54 = arith.addf %47, %53 : vector<1x16x16x128xf32>
    %55 = vector.extract_strided_slice %1 {offsets = [0, 2, 1, 0], sizes = [1, 16, 16, 128], strides = [1, 1, 1, 1]} : vector<1x18x18x128xbf16> to vector<1x16x16x128xbf16>
    %56 = vector.extract_strided_slice %2 {offsets = [7, 0], sizes = [1, 128], strides = [1, 1]} : vector<9x128xf32> to vector<1x128xf32>
    %57 = vector.shape_cast %56 : vector<1x128xf32> to vector<1x1x1x128xf32>
    %58 = arith.extf %55 : vector<1x16x16x128xbf16> to vector<1x16x16x128xf32>
    %59 = vector.broadcast %57 : vector<1x1x1x128xf32> to vector<1x16x16x128xf32>
    %60 = arith.mulf %58, %59 : vector<1x16x16x128xf32>
    %61 = arith.addf %54, %60 : vector<1x16x16x128xf32>
    %62 = vector.extract_strided_slice %1 {offsets = [0, 2, 2, 0], sizes = [1, 16, 16, 128], strides = [1, 1, 1, 1]} : vector<1x18x18x128xbf16> to vector<1x16x16x128xbf16>
    %63 = vector.extract_strided_slice %2 {offsets = [8, 0], sizes = [1, 128], strides = [1, 1]} : vector<9x128xf32> to vector<1x128xf32>
    %64 = vector.shape_cast %63 : vector<1x128xf32> to vector<1x1x1x128xf32>
    %65 = arith.extf %62 : vector<1x16x16x128xbf16> to vector<1x16x16x128xf32>
    %66 = vector.broadcast %64 : vector<1x1x1x128xf32> to vector<1x16x16x128xf32>
    %67 = arith.mulf %65, %66 : vector<1x16x16x128xf32>
    %68 = arith.addf %61, %67 : vector<1x16x16x128xf32>
    %69 = vector.broadcast %4 : vector<1x1x1x128xf32> to vector<1x16x16x128xf32>
    %70 = arith.addf %68, %69 : vector<1x16x16x128xf32>
    %cst_7 = arith.constant 0.000000e+00 : f32
    %71 = vector.broadcast %cst_7 : f32 to vector<1x16x16x128xf32>
    %72 = arith.maximumf %70, %71 : vector<1x16x16x128xf32>
    %73 = arith.truncf %72 : vector<1x16x16x128xf32> to vector<1x16x16x128xbf16>
    %74 = vector.shape_cast %73 : vector<1x16x16x128xbf16> to vector<256x128xbf16>
    %c0_8 = arith.constant 0 : index
    %c0_9 = arith.constant 0 : index
    %75 = vector.load %arg5[%c0_8, %c0_9] : memref<128x128xbf16, #tpu.memory_space<vmem>>, vector<128x128xbf16>
    %cst_10 = arith.constant dense<0.000000e+00> : vector<256x128xf32>
    %76 = tpu.matmul %74, %75, %cst_10 {dimension_numbers = #tpu.dot_dimension_numbers<[1], [0], [0], [1], [0, 0, 1, 1], [], []>} : vector<256x128xbf16>, vector<128x128xbf16>, vector<256x128xf32> -> vector<256x128xf32>
    %c0_11 = arith.constant 0 : index
    %c0_12 = arith.constant 0 : index
    %77 = vector.load %arg6[%c0_11, %c0_12] : memref<1x128xf32, #tpu.memory_space<vmem>>, vector<1x128xf32>
    %78 = vector.broadcast %77 : vector<1x128xf32> to vector<256x128xf32>
    %79 = arith.addf %76, %78 : vector<256x128xf32>
    %cst_13 = arith.constant 0.000000e+00 : f32
    %80 = vector.broadcast %cst_13 : f32 to vector<256x128xf32>
    %81 = arith.maximumf %79, %80 : vector<256x128xf32>
    %82 = vector.shape_cast %81 : vector<256x128xf32> to vector<1x16x16x128xf32>
    %c0_14 = arith.constant 0 : index
    %c0_15 = arith.constant 0 : index
    %c0_16 = arith.constant 0 : index
    %c0_17 = arith.constant 0 : index
    %83 = vector.load %arg7[%c0_14, %c0_15, %c0_16, %c0_17] : memref<1x16x16x128xf32, #tpu.memory_space<vmem>>, vector<1x16x16x128xf32>
    tpu.vector_store %arg7[%c0_14, %c0_15, %c0_16, %c0_17], %82 {strides = array<i32>} : memref<1x16x16x128xf32, #tpu.memory_space<vmem>>, vector<1x16x16x128xf32>,
    return
  }
  func.func @transform_0(%arg0: i32, %arg1: i32) -> (i32, i32, i32, i32) {
    %c0_i32 = arith.constant 0 : i32
    %c0_i32_0 = arith.constant 0 : i32
    %c0_i32_1 = arith.constant 0 : i32
    %c0_i32_2 = arith.constant 0 : i32
    return %arg0, %c0_i32, %c0_i32_0, %c0_i32_1 : i32, i32, i32, i32
  }
  func.func @transform_1(%arg0: i32, %arg1: i32) -> (i32, i32) {
    %c0_i32 = arith.constant 0 : i32
    %c0_i32_0 = arith.constant 0 : i32
    %c0_i32_1 = arith.constant 0 : i32
    return %c0_i32, %c0_i32_0 : i32, i32
  }
  func.func @transform_2(%arg0: i32, %arg1: i32) -> (i32, i32) {
    %c0_i32 = arith.constant 0 : i32
    %c0_i32_0 = arith.constant 0 : i32
    %c0_i32_1 = arith.constant 0 : i32
    return %c0_i32, %c0_i32_0 : i32, i32
  }
  func.func @transform_3(%arg0: i32, %arg1: i32) -> (i32, i32) {
    %c0_i32 = arith.constant 0 : i32
    %c0_i32_0 = arith.constant 0 : i32
    %c0_i32_1 = arith.constant 0 : i32
    return %c0_i32, %c0_i32_0 : i32, i32
  }
  func.func @transform_4(%arg0: i32, %arg1: i32) -> (i32, i32) {
    %c0_i32 = arith.constant 0 : i32
    %c0_i32_0 = arith.constant 0 : i32
    %c0_i32_1 = arith.constant 0 : i32
    return %c0_i32, %c0_i32_0 : i32, i32
  }
  func.func @transform_5(%arg0: i32, %arg1: i32) -> (i32, i32, i32, i32) {
    %c0_i32 = arith.constant 0 : i32
    %c0_i32_0 = arith.constant 0 : i32
    %c0_i32_1 = arith.constant 0 : i32
    return %arg0, %arg1, %c0_i32, %c0_i32_0 : i32, i32, i32, i32
  }
}

</mosaic_0001>

<bundles_post_ra>
// kernel: tpu_custom_call.1
= control target key start
LH: loop header
LB: loop body
LE: loop exit
PB: predicated region body
PF: predicated region fallthrough
CT: control target
= control target key end

     0   :  { %10 = vsyncpa [#allocation3], 0  ;;  %s5157_s0 = inlined_call_operand.vmem [shape: bf16[2,18,18,64], index: 0, kind: input, shape index: {}]   ;;  %s5158_s1 = inlined_call_operand.vmem [shape: f32[9,128], index: 1, kind: input, shape index: {}]   ;;  %s5159_s2 = inlined_call_operand.vmem [shape: f32[1,128], index: 2, kind: input, shape index: {}]   ;;  %s5160_s3 = inlined_call_operand.vmem [shape: bf16[128,128], index: 3, kind: input, shape index: {}]   ;;  %s5161_s4 = inlined_call_operand.vmem [shape: f32[1,128], index: 4, kind: input, shape index: {}]   ;;  %s5162_s5 = inlined_call_operand.hbm [shape: f32[2,16,16,128], index: 5, kind: output, shape index: {}]  }
   0x1   :  { %12 = vsyncpa [#allocation3 + $0x1], 0  ;;  %s3232_s18 = smov 0   ;;  %s3234_s19 = smov 0  }
   0x2   :  { %s3236_s20 = smov 0   ;;  %s3238_s21 = smov 0  }
   0x3   :  { %s3240_s22 = smov 0   ;;  %s3242_s23 = smov 0  }
   0x4 LB: > { %s2853_s24 = sadd.s32 4294967295, %s3196_s23   ;;  %s2854_s25 = sadd.s32 4294967294, %s3196_s23   ;;  %s3196_s23 = sphi %s3242_s23, %s18_s23   ;;  %s3192_s22 = sphi %s3240_s22, %s5422_s22   ;;  %s3188_s21 = sphi %s3238_s21, %s5421_s21   ;;  %s3184_s20 = sphi %s3236_s20, %s5420_s20   ;;  %s3180_s19 = sphi %s3234_s19, %s5419_s19   ;;  %s3176_s18 = sphi %s3232_s18, %s5418_s18  }
   0x5   : > { %s30_s26 = sadd.s32 1, %s3192_s22  ;;  %s149_s27 = sadd.s32 1, %s3184_s20 }
   0x6   : > { %p32_p0 = scmp.ge.s32.totalorder %s30_s26, 2  ;;  %p159_p1 = scmp.ne.s32.totalorder %s3184_s20, %s3180_s19 }
   0x7   : > { %p160_p2 = scmp.eq.s32.totalorder %s2853_s24, 1  ;;  %p165_p3 = scmp.ne.s32.totalorder %s3180_s19, %s3176_s18 }
   0x8   : > { %s5424_s26 = smov (%p32_p0, %s30_s26), 0  ;;  %p166_p5 = scmp.eq.s32.totalorder %s2854_s25, 1 }
   0x9   : > { %p3272_p4 = por %p160_p2, %p159_p1  ;;  %s144_s29 = ssub.s32 %s3192_s22, %s5424_s26 }
   0xa   : > { %p2857_p6 = scmp.ge.s32.totalorder %s3196_s23, 1  ;;  %p147_p7 = scmp.eq.s32.totalorder %s144_s29, 0 }
   0xb   : > { %p3279_p8 = por %p166_p5, %p165_p3  ;;  %p204_p9 = scmp.lt.s32.totalorder %s3196_s23, 3 }
   0xc   : > { %s3285_s6 = scalar_select %p147_p7, %s3184_s20, %s149_s27  }
   0xd   : > { %p205_p10 = pnand %p2857_p6, %p204_p9 }
   0xf   : > { %208 = sbr.rel (%p205_p10) target bundleno = 716 (0x2cc), region = 40 }
  0x16   : > { %p232_p11 = scmp.lt.s32.totalorder %s3188_s21, 1  ;;  %s3198_s12 = smov 64   ;;  %v3096_v16 = vld [vmem:[%s5160_s3] sm:$0xff]   ;;  %v3097_v18 = vld [vmem:[%s5160_s3 + $0x8] sm:$0xff]   ;;  %v3098_v20 = vld [vmem:[%s5160_s3 + $0x10] sm:$0xff]   ;;  %v689_v44 = vlaneseq  ;;  %vm509_vm0 = vcmask 523264  }
  0x17   : > { %2937 = vmatprep.subr.bf16.mxu0 %v3096_v16  ;;  %2985 = vmatprep.subr.bf16.mxu1 %v3096_v16  ;;  %v3099_v23 = vld [vmem:[%s5160_s3 + $0x18] sm:$0xff]   ;;  %v3100_v26 = vld [vmem:[%s5160_s3 + $0x20] sm:$0xff]   ;;  %v3101_v29 = vld [vmem:[%s5160_s3 + $0x28] sm:$0xff]   ;;  %vm873_vm1 = vcmask 1046528   ;;  %vm1118_vm2 = vcmask 1045504   ;;  %s229_s13 = sand.u32 1, %s3180_s19  }
  0x18   : > { %s233_s7 = scalar_select %p232_p11, %s3188_s21, 1  ;;  %2938 = vmatpush3.bf16.msra.mxu0 %v3096_v16  ;;  %2993 = vmatpush3.bf16.msra.mxu1 %v3096_v16  ;;  %v3102_v32 = vld [vmem:[%s5160_s3 + $0x30] sm:$0xff]   ;;  %v3103_v35 = vld [vmem:[%s5160_s3 + $0x38] sm:$0xff]   ;;  %v690_v45 = vshrl.u32 %v689_v44, 7  ;;  %v654_v48 = vld [vmem:[%s5158_s1] sm:$0xff] }
  0x19   : > { %2939 = vmatprep.subr.bf16.mxu0 %v3097_v18  ;;  %2986 = vmatprep.subr.bf16.mxu1 %v3097_v18  ;;  %s2858_s16 = sshll.u32 %s229_s13, 8  ;;  %s2912_s25 = sshll.u32 %s3188_s21, 12 }
  0x1a   : > { %s3001_s8 = smul.u32 216, %s233_s7  ;;  %v691_v46 = vsub.s32 0, %v690_v45  ;;  %v775_v47 = vsub.s32 1, %v690_v45  ;;  %v1020_v49 = vsub.s32 2, %v690_v45  ;;  %v1336_v50 = vsub.s32 4, %v690_v45  ;;  %s5038_s24 = scalar_lea.vmem [#allocation2], %s2858_s16 }
  0x1b   : > { %v1580_v51 = vsub.s32 5, %v690_v45  ;;  %v1267_v52 = vsub.s32 3, %v690_v45  ;;  %v1826_v53 = vsub.s32 6, %v690_v45  ;;  %v1895_v54 = vsub.s32 7, %v690_v45  ;;  %s2780_s27 = sshll.u32 %s5038_s24, 4  ;;  %s5099_s7 = scalar_lea.hbm %s5162_s5, %s2912_s25  ;;  %s5101_s27 = int_to_ptr.vmem [resolvable:$true] %s2780_s27 }
  0x1c   : > { %s3292_s11 = scalar_lea.vmem %s5157_s0, %s3001_s8  ;;  %2940 = vmatpush3.bf16.msra.mxu0 %v3097_v18  ;;  %2994 = vmatpush3.bf16.msra.mxu1 %v3097_v18  ;;  %v3471_v56 = vrot.slane %v654_v48, %v691_v46  ;;  %v3473_v57 = vrot.slane %v654_v48, %v775_v47  ;;  %v3477_v59 = vrot.slane %v654_v48, %v1020_v49  ;;  %s5111_s8 = scalar_lea.sflag [#allocation3], %s229_s13 }
  0x1d   : > { %v3295_v0 = vld [vmem:[%s3292_s11 + $0x60] sm:$0xff]   ;;  %v3303_v2 = vld [vmem:[%s3292_s11 + $0x68] ss:$0 sps:$4 sm:$0x11]   ;;  %v3316_v5 = vld [vmem:[%s3292_s11 + $0xc] sm:$0xff]   ;;  %2941 = vmatprep.subr.bf16.mxu0 %v3098_v20  ;;  %2987 = vmatprep.subr.bf16.mxu1 %v3098_v20  ;;  %v3479_v61 = vrot.slane %v654_v48, %v1336_v50  ;;  %v3481_v62 = vrot.slane %v654_v48, %v1580_v51  ;;  %s3118_s9 = scalar_lea.vmem %s5101_s27, 4096 }
  0x1e   : > { %v3298_v1 = vld [vmem:[%s3292_s11] sm:$0xff]   ;;  %469 = vrot.lane.b32.xlu1 %v3295_v0, %s3198_s12  ;;  %v3308_v3 = vld [vmem:[%s3292_s11 + $0x8] ss:$0 sps:$4 sm:$0x11]   ;;  %v3328_v7 = vld [vmem:[%s3292_s11 + $0x6c] sm:$0xff]   ;;  %5234 = vst [vmem:[#allocation9_spill] sm:$0xff] %v3471_v56  ;;  %p3119_p12 = scmp.ne.s32.totalorder %s5101_s27, %s3118_s9 }
  0x1f   : > { %437 = vrot.lane.b32.xlu0 %v3298_v1, %s3198_s12  ;;  %v3313_v4 = vld [vmem:[%s3292_s11 + $0x14] ss:$0 sps:$4 sm:$0x11]   ;;  %v3333_v8 = vld [vmem:[%s3292_s11 + $0x20] ss:$0 sps:$4 sm:$0x11]  }
  0x20   : > { %v3321_v6 = vld [vmem:[%s3292_s11 + $0x74] ss:$0 sps:$4 sm:$0x11]   ;;  %v3336_v9 = vld [vmem:[%s3292_s11 + $0x18] sm:$0xff]   ;;  %v3358_v13 = vld [vmem:[%s3292_s11 + $0x24] sm:$0xff]   ;;  %2942 = vmatpush3.bf16.msra.mxu0 %v3098_v20  ;;  %2995 = vmatpush3.bf16.msra.mxu1 %v3098_v20  ;;  %v3489_v20 = vrot.slane %v654_v48, %v1267_v52  ;;  %p3120_p13 = pnand %p3119_p12, %p3272_p4 }
  0x21   : > { %v3343_v10 = vld [vmem:[%s3292_s11 + $0x80] ss:$0 sps:$4 sm:$0x11]   ;;  %v3348_v11 = vld [vmem:[%s3292_s11 + $0x78] sm:$0xff]   ;;  %v3366_v15 = vld [vmem:[%s3292_s11 + $0x84] sm:$0xff]   ;;  %2943 = vmatprep.subr.bf16.mxu0 %v3099_v23  ;;  %2988 = vmatprep.subr.bf16.mxu1 %v3099_v23 }
  0x22   : > { %471 = vrot.lane.b32.xlu1 %v3303_v2, %s3198_s12  ;;  %v3351_v12 = vld [vmem:[%s3292_s11 + $0x2c] ss:$0 sps:$4 sm:$0x11]   ;;  %v3374_v17 = vld [vmem:[%s3292_s11 + $0x38] ss:$0 sps:$4 sm:$0x11]   ;;  %p3121_p0 = pneg %p3120_p13 }
  0x23   : > { %439 = vrot.lane.b32.xlu0 %v3308_v3, %s3198_s12  ;;  %v3363_v14 = vld [vmem:[%s3292_s11 + $0x8c] ss:$0 sps:$4 sm:$0x11]   ;;  %v3384_v19 = vld [vmem:[%s3292_s11 + $0x30] sm:$0xff]   ;;  %v3410_v25 = vld [vmem:[%s3292_s11 + $0x3c] sm:$0xff]  }
  0x24   : > { %v3392_v21 = vld [vmem:[%s3292_s11 + $0x98] ss:$0 sps:$4 sm:$0x11]   ;;  %v3397_v22 = vld [vmem:[%s3292_s11 + $0x90] sm:$0xff]   ;;  %v3423_v28 = vld [vmem:[%s3292_s11 + $0x9c] sm:$0xff]   ;;  %2944 = vmatpush3.bf16.msra.mxu0 %v3099_v23  ;;  %2996 = vmatpush3.bf16.msra.mxu1 %v3099_v23 }
  0x25   : > { %v3405_v24 = vld [vmem:[%s3292_s11 + $0x44] ss:$0 sps:$4 sm:$0x11]   ;;  %5231 = vst [vmem:[#allocation6_spill] sm:$0xff] %v3423_v28  ;;  %2945 = vmatprep.subr.bf16.mxu0 %v3100_v26  ;;  %2989 = vmatprep.subr.bf16.mxu1 %v3100_v26  ;;  %v3436_v31 = vld [vmem:[%s3292_s11 + $0x48] sm:$0xff]   ;;  %v3089_v37 = vld [vmem:[%s3292_s11 + $0x54] sm:$0xff]  }
  0x26   : > { %443 = vrot.lane.b32.xlu1 %v3313_v4, %s3198_s12  ;;  %v3418_v27 = vld [vmem:[%s3292_s11 + $0xa4] ss:$0 sps:$4 sm:$0x11]   ;;  %v3431_v30 = vld [vmem:[%s3292_s11 + $0x50] ss:$0 sps:$4 sm:$0x11]  }
  0x27   : > { %441 = vrot.lane.b32.xlu0 %v3316_v5, %s3198_s12  ;;  %5230 = vst [vmem:[#allocation5_spill] sm:$0xff] %v3418_v27  ;;  %5232 = vst [vmem:[#allocation7_spill] sm:$0xff] %v3431_v30  ;;  %v3086_v33 = vld [vmem:[%s3292_s11 + $0xb0] ss:$0 sps:$4 sm:$0x11]   ;;  %v3087_v34 = vld [vmem:[%s3292_s11 + $0xa8] sm:$0xff]  }
  0x28   : > { %5233 = vst [vmem:[#allocation8_spill] sm:$0xff] %v3436_v31  ;;  %2946 = vmatpush3.bf16.msra.mxu0 %v3100_v26  ;;  %2997 = vmatpush3.bf16.msra.mxu1 %v3100_v26  ;;  %v3088_v36 = vld [vmem:[%s3292_s11 + $0x5c] ss:$0 sps:$4 sm:$0x11]   ;;  %v3091_v39 = vld [vmem:[%s3292_s11 + $0xb4] sm:$0xff]   ;;  %v3093_v41 = vld [vmem:[%s3292_s11 + $0xc0] sm:$0xff]  }
  0x29   : > { %2947 = vmatprep.subr.bf16.mxu0 %v3101_v29  ;;  %2990 = vmatprep.subr.bf16.mxu1 %v3101_v29  ;;  %v3090_v38 = vld [vmem:[%s3292_s11 + $0xbc] ss:$0 sps:$4 sm:$0x11]   ;;  %v3092_v40 = vld [vmem:[%s3292_s11 + $0xc8] ss:$0 sps:$4 sm:$0x11]  }
  0x2a   : > { %475 = vrot.lane.b32.xlu1 %v3321_v6, %s3198_s12  ;;  %v3094_v42 = vld [vmem:[%s3292_s11 + $0xd4] ss:$0 sps:$4 sm:$0x11]   ;;  %v3095_v43 = vld [vmem:[%s3292_s11 + $0xcc] sm:$0xff]  }
  0x2b   : > { %473 = vrot.lane.b32.xlu0 %v3328_v7, %s3198_s12 }
  0x2c   : > { %2948 = vmatpush3.bf16.msra.mxu0 %v3101_v29  ;;  %2998 = vmatpush3.bf16.msra.mxu1 %v3101_v29  ;;  %v3491_v29 = vrot.slane %v654_v48, %v1826_v53 }
  0x2d   : > { %2949 = vmatprep.subr.bf16.mxu0 %v3102_v32  ;;  %2991 = vmatprep.subr.bf16.mxu1 %v3102_v32 }
  0x2e   : > { %447 = vrot.lane.b32.xlu1 %v3333_v8, %s3198_s12 }
  0x2f   : > { %445 = vrot.lane.b32.xlu0 %v3336_v9, %s3198_s12 }
  0x30   : > { %2950 = vmatpush3.bf16.msra.mxu0 %v3102_v32  ;;  %2999 = vmatpush3.bf16.msra.mxu1 %v3102_v32 }
  0x31   : > { %2951 = vmatprep.subr.bf16.mxu0 %v3103_v35  ;;  %2992 = vmatprep.subr.bf16.mxu1 %v3103_v35 }
  0x32   : > { %479 = vrot.lane.b32.xlu1 %v3343_v10, %s3198_s12 }
  0x33   : > { %477 = vrot.lane.b32.xlu0 %v3348_v11, %s3198_s12 }
  0x34   : > { %2952 = vmatpush3.bf16.msra.mxu0 %v3103_v35  ;;  %3000 = vmatpush3.bf16.msra.mxu1 %v3103_v35 }
  0x36   : > { %451 = vrot.lane.b32.xlu1 %v3351_v12, %s3198_s12 }
  0x37   : > { %449 = vrot.lane.b32.xlu0 %v3358_v13, %s3198_s12 }
  0x3a   : > { %483 = vrot.lane.b32.xlu1 %v3363_v14, %s3198_s12 }
  0x3b   : > { %481 = vrot.lane.b32.xlu0 %v3366_v15, %s3198_s12 }
  0x3e   : > { %455 = vrot.lane.b32.xlu1 %v3374_v17, %s3198_s12 }
  0x3f   : > { %453 = vrot.lane.b32.xlu0 %v3384_v19, %s3198_s12 }
  0x42   : > { %487 = vrot.lane.b32.xlu1 %v3392_v21, %s3198_s12 }
  0x43   : > { %485 = vrot.lane.b32.xlu0 %v3397_v22, %s3198_s12 }
  0x46   : > { %459 = vrot.lane.b32.xlu1 %v3405_v24, %s3198_s12 }
  0x47   : > { %457 = vrot.lane.b32.xlu0 %v3410_v25, %s3198_s12 }
  0x4a   : > { %491 = vrot.lane.b32.xlu1 %v3418_v27, %s3198_s12 }
  0x4b   : > { %489 = vrot.lane.b32.xlu0 %v3423_v28, %s3198_s12 }
  0x4e   : > { %463 = vrot.lane.b32.xlu1 %v3431_v30, %s3198_s12 }
  0x4f   : > { %461 = vrot.lane.b32.xlu0 %v3436_v31, %s3198_s12 }
  0x52   : > { %495 = vrot.lane.b32.xlu1 %v3086_v33, %s3198_s12 }
  0x53   : > { %493 = vrot.lane.b32.xlu0 %v3087_v34, %s3198_s12 }
  0x56   : > { %467 = vrot.lane.b32.xlu1 %v3088_v36, %s3198_s12 }
  0x57   : > { %465 = vrot.lane.b32.xlu0 %v3089_v37, %s3198_s12 }
  0x5a   : > { %499 = vrot.lane.b32.xlu1 %v3090_v38, %s3198_s12 }
  0x5b   : > { %497 = vrot.lane.b32.xlu0 %v3091_v39, %s3198_s12 }
  0x5e   : > { %503 = vrot.lane.b32.xlu1 %v3092_v40, %s3198_s12 }
  0x5f   : > { %501 = vrot.lane.b32.xlu0 %v3093_v41, %s3198_s12 }
  0x62   : > { %507 = vrot.lane.b32.xlu1 %v3094_v42, %s3198_s12 }
  0x63   : > { %505 = vrot.lane.b32.xlu0 %v3095_v43, %s3198_s12 }
  0x90   : > { %v470_v55 = vpop.permute.xlu1 %469 }
  0x91   : > { %v576_v58 = vsel %vm509_vm0, %v3295_v0, %v470_v55  ;;  %v438_v60 = vpop.permute.xlu0 %437  ;;  %v3493_v0 = vrot.slane %v654_v48, %v1895_v54 }
  0x92   : > { %v3483_v63 = vunpack.c.l.bf16 %v576_v58  ;;  %v3485_v16 = vunpack.c.h.bf16 %v576_v58  ;;  %v512_v18 = vsel %vm509_vm0, %v3298_v1, %v438_v60 }
  0x93   : > { %v657_v23 = vunpack.c.l.bf16 %v512_v18  ;;  %v658_v26 = vunpack.c.h.bf16 %v512_v18 }
  0x94   : > { %5235 = vst [vmem:[#allocation10_spill] sm:$0xff] %v3483_v63  ;;  %5236 = vst [vmem:[#allocation11_spill] sm:$0xff] %v3485_v16  ;;  %v472_v32 = vpop.permute.xlu1 %471  ;;  %v3497_v33 = vmul.f32 %v3471_v56, %v3483_v63  ;;  %v3501_v34 = vmul.f32 %v3471_v56, %v3485_v16  ;;  %v801_v1 = vmul.f32 %v3473_v57, %v3483_v63 }
  0x95   : > { %v3507_v35 = vmul.f32 %v3473_v57, %v3485_v16  ;;  %v693_v36 = vmul.f32 %v3471_v56, %v657_v23  ;;  %v694_v37 = vmul.f32 %v3471_v56, %v658_v26  ;;  %v777_v38 = vmul.f32 %v3473_v57, %v657_v23  ;;  %v440_v40 = vpop.permute.xlu0 %439 }
  0x96   : > { %v778_v39 = vmul.f32 %v3473_v57, %v658_v26  ;;  %v1022_v41 = vmul.f32 %v3477_v59, %v657_v23  ;;  %v1023_v42 = vmul.f32 %v3477_v59, %v658_v26  ;;  %v580_v43 = vsel %vm509_vm0, %v3303_v2, %v472_v32 }
  0x97   : > { %v516_v44 = vsel %vm509_vm0, %v3308_v3, %v440_v40  ;;  %v874_v45 = vrot.slane %v777_v38, 1  ;;  %v3519_v47 = vunpack.c.l.bf16 %v580_v43  ;;  %v914_v52 = vrot.slane %v801_v1, 1 }
  0x98   : > { %v875_v46 = vrot.slane %v778_v39, 1  ;;  %v757_v48 = vunpack.c.l.bf16 %v516_v44  ;;  %v1119_v49 = vrot.slane %v1022_v41, 2  ;;  %v1120_v50 = vrot.slane %v1023_v42, 2  ;;  %v444_v51 = vpop.permute.xlu1 %443 }
  0x99   : > { %5237 = vst [vmem:[#allocation12_spill] sm:$0xff] %v3519_v47  ;;  %v5163_v53 = vrot.slane %v3507_v35, 1  ;;  %v3525_v55 = vmul.f32 %v3473_v57, %v3519_v47  ;;  %v3529_v2 = vmul.f32 %v3477_v59, %v3519_v47  ;;  %v3533_v3 = vmul.f32 %v3479_v61, %v3519_v47  ;;  %v442_v58 = vpop.permute.xlu0 %441 }
  0x9a   : > { %v876_v54 = vsel %vm873_vm1, %v874_v45, %v875_v46  ;;  %v1121_v18 = vsel %vm1118_vm2, %v1119_v49, %v1120_v50  ;;  %v3538_v23 = vmul.f32 %v3481_v62, %v3519_v47  ;;  %v779_v26 = vmul.f32 %v3473_v57, %v757_v48 }
  0x9b   : > { %5238 = vst [vmem:[#allocation13_spill] sm:$0xff] %v3533_v3  ;;  %v986_v60 = vadd.f32 %v876_v54, %v693_v36  ;;  %v1024_v39 = vmul.f32 %v3477_v59, %v757_v48  ;;  %v524_v36 = vsel %vm509_vm0, %v3313_v4, %v444_v51  ;;  %v520_v42 = vsel %vm509_vm0, %v3316_v5, %v442_v58 }
  0x9c   : > { %5239 = vst [vmem:[#allocation14_spill] sm:$0xff] %v3538_v23  ;;  %v877_v41 = vrot.slane %v779_v26, 1  ;;  %v476_v43 = vpop.permute.xlu1 %475  ;;  %v758_v45 = vunpack.c.l.bf16 %v524_v36  ;;  %v3551_v49 = vunpack.c.l.bf16 %v520_v42  ;;  %v3553_v54 = vunpack.c.h.bf16 %v520_v42 }
  0x9d   : > { %v3545_v40 = vadd.f32 %v1121_v18, %v986_v60  ;;  %v1122_v44 = vrot.slane %v1024_v39, 2  ;;  %v474_v1 = vpop.permute.xlu0 %473  ;;  %v588_v48 = vsel %vm509_vm0, %v3321_v6, %v476_v43  ;;  %v3563_v4 = vsel %vm873_vm1, %v914_v52, %v5163_v53 }
  0x9e   : > { %v878_v38 = vsel %vm873_vm1, %v875_v46, %v877_v41  ;;  %v584_v60 = vsel %vm509_vm0, %v3328_v7, %v474_v1  ;;  %v3567_v58 = vmul.f32 %v3473_v57, %v758_v45  ;;  %v3570_v18 = vmul.f32 %v3477_v59, %v758_v45 }
  0x9f   : > { %v987_v5 = vadd.f32 %v878_v38, %v694_v37  ;;  %v1123_v51 = vsel %vm1118_vm2, %v1120_v50, %v1122_v44  ;;  %v3573_v46 = vmul.f32 %v3479_v61, %v758_v45  ;;  %v3576_v6 = vmul.f32 %v3481_v62, %v758_v45 }
  0xa0   : > { %v3580_v7 = vmul.f32 %v3471_v56, %v3551_v49  ;;  %v3584_v37 = vmul.f32 %v3471_v56, %v3553_v54  ;;  %v448_v50 = vpop.permute.xlu1 %447  ;;  %v3592_v38 = vmul.f32 %v3473_v57, %v3551_v49  ;;  %v3598_v42 = vmul.f32 %v3473_v57, %v3553_v54 }
  0xa1   : > { %v3586_v52 = vadd.f32 %v1123_v51, %v987_v5  ;;  %v446_v39 = vpop.permute.xlu0 %445  ;;  %v3602_v43 = vmul.f32 %v3477_v59, %v3551_v49  ;;  %v3607_v45 = vmul.f32 %v3477_v59, %v3553_v54  ;;  %v3609_v5 = vunpack.c.l.bf16 %v588_v48 }
  0xa2   : > { %v3611_v51 = vunpack.c.l.bf16 %v584_v60  ;;  %v3615_v53 = vunpack.c.h.bf16 %v584_v60  ;;  %v532_v32 = vsel %vm509_vm0, %v3333_v8, %v448_v50  ;;  %v528_v60 = vsel %vm509_vm0, %v3336_v9, %v446_v39 }
  0xa3   : > { %5240 = vst [vmem:[#allocation15_spill] sm:$0xff] %v3609_v5  ;;  %v3622_v41 = vmul.f32 %v3473_v57, %v3609_v5  ;;  %v3626_v48 = vmul.f32 %v3477_v59, %v3609_v5  ;;  %v3628_v3 = vunpack.c.l.bf16 %v532_v32  ;;  %v1269_v26 = vmul.f32 %v3489_v20, %v3551_v49 }
  0xa4   : > { %5241 = vst [vmem:[#allocation16_spill] sm:$0xff] %v3611_v51  ;;  %5242 = vst [vmem:[#allocation17_spill] sm:$0xff] %v3615_v53  ;;  %v480_v36 = vpop.permute.xlu1 %479  ;;  %v3658_v39 = vunpack.c.h.bf16 %v528_v60 }
  0xa5   : > { %5243 = vst [vmem:[#allocation18_spill] sm:$0xff] %v3622_v41  ;;  %5244 = vst [vmem:[#allocation19_spill] sm:$0xff] %v3626_v48  ;;  %v478_v1 = vpop.permute.xlu0 %477  ;;  %v596_v8 = vsel %vm509_vm0, %v3343_v10, %v480_v36  ;;  %v3642_v32 = vmul.f32 %v3473_v57, %v3628_v3  ;;  %v3646_v9 = vmul.f32 %v3477_v59, %v3628_v3 }
  0xa6   : > { %v592_v50 = vsel %vm509_vm0, %v3348_v11, %v478_v1  ;;  %v3650_v10 = vmul.f32 %v3479_v61, %v3628_v3  ;;  %v3654_v11 = vmul.f32 %v3481_v62, %v3628_v3  ;;  %v3656_v1 = vunpack.c.l.bf16 %v528_v60 }
  0xa7   : > { %5245 = vst [vmem:[#allocation20_spill] sm:$0xff] %v3642_v32  ;;  %5246 = vst [vmem:[#allocation21_spill] sm:$0xff] %v3646_v9  ;;  %v3662_v47 = vunpack.c.l.bf16 %v596_v8  ;;  %v3664_v31 = vunpack.c.l.bf16 %v592_v50  ;;  %v3667_v41 = vunpack.c.h.bf16 %v592_v50  ;;  %v1270_v48 = vmul.f32 %v3489_v20, %v3553_v54 }
  0xa8   : > { %5247 = vst [vmem:[#allocation22_spill] sm:$0xff] %v3650_v10  ;;  %v452_v36 = vpop.permute.xlu1 %451 }
  0xa9   : > { %v450_v30 = vpop.permute.xlu0 %449  ;;  %v540_v56 = vsel %vm509_vm0, %v3351_v12, %v452_v36  ;;  %v3675_v23 = vmul.f32 %v3473_v57, %v3662_v47  ;;  %v3679_v8 = vmul.f32 %v3477_v59, %v3662_v47  ;;  %v3683_v44 = vmul.f32 %v3479_v61, %v3662_v47 }
  0xaa   : > { %v536_v60 = vsel %vm509_vm0, %v3358_v13, %v450_v30  ;;  %v3687_v50 = vmul.f32 %v3481_v62, %v3662_v47  ;;  %v3689_v12 = vunpack.c.l.bf16 %v540_v56  ;;  %v1302_v28 = vadd.f32 %v1270_v48, %v3586_v52 }
  0xab   : > { %5248 = vst [vmem:[#allocation23_spill] sm:$0xff] %v3675_v23  ;;  %5249 = vst [vmem:[#allocation24_spill] sm:$0xff] %v3679_v8  ;;  %v3691_v36 = vunpack.c.l.bf16 %v536_v60  ;;  %v3693_v13 = vunpack.c.h.bf16 %v536_v60  ;;  %v1338_v8 = vmul.f32 %v3479_v61, %v3551_v49 }
  0xac   : > { %5250 = vst [vmem:[#allocation25_spill] sm:$0xff] %v3683_v44  ;;  %5251 = vst [vmem:[#allocation26_spill] sm:$0xff] %v3687_v50  ;;  %v484_v30 = vpop.permute.xlu1 %483  ;;  %v3704_v56 = vmul.f32 %v3473_v57, %v3689_v12  ;;  %v3708_v60 = vmul.f32 %v3477_v59, %v3689_v12  ;;  %v3712_v10 = vmul.f32 %v3479_v61, %v3689_v12 }
  0xad   : > { %5252 = vst [vmem:[#allocation27_spill] sm:$0xff] %v3691_v36  ;;  %5253 = vst [vmem:[#allocation28_spill] sm:$0xff] %v3693_v13  ;;  %v604_v27 = vsel %vm509_vm0, %v3363_v14, %v484_v30  ;;  %v482_v50 = vpop.permute.xlu0 %481  ;;  %v3716_v32 = vmul.f32 %v3481_v62, %v3689_v12  ;;  %v1301_v30 = vadd.f32 %v1269_v26, %v3545_v40 }
  0xae   : > { %5254 = vst [vmem:[#allocation29_spill] sm:$0xff] %v3704_v56  ;;  %5255 = vst [vmem:[#allocation30_spill] sm:$0xff] %v3708_v60  ;;  %v3718_v9 = vunpack.c.l.bf16 %v604_v27  ;;  %v600_v14 = vsel %vm509_vm0, %v3366_v15, %v482_v50  ;;  %v1583_v44 = vmul.f32 %v3481_v62, %v3553_v54  ;;  %v1828_v56 = vmul.f32 %v3491_v29, %v3656_v1 }
  0xaf   : > { %5256 = vst [vmem:[#allocation31_spill] sm:$0xff] %v3712_v10  ;;  %5257 = vst [vmem:[#allocation32_spill] sm:$0xff] %v3716_v32  ;;  %v3727_v13 = vunpack.c.l.bf16 %v600_v14  ;;  %v3745_v48 = vunpack.c.h.bf16 %v600_v14 }
  0xb0   : > { %5258 = vst [vmem:[#allocation33_spill] sm:$0xff] %v3718_v9  ;;  %v456_v36 = vpop.permute.xlu1 %455  ;;  %v3731_v27 = vmul.f32 %v3473_v57, %v3718_v9  ;;  %v3735_v15 = vmul.f32 %v3477_v59, %v3718_v9  ;;  %v3739_v40 = vmul.f32 %v3479_v61, %v3718_v9  ;;  %v3743_v52 = vmul.f32 %v3481_v62, %v3718_v9 }
  0xb1   : > { %v454_v26 = vpop.permute.xlu0 %453  ;;  %5263 = vst [vmem:[#allocation38_spill] sm:$0xff] %v3745_v48  ;;  %v548_v50 = vsel %vm509_vm0, %v3374_v17, %v456_v36  ;;  %v1339_v17 = vmul.f32 %v3479_v61, %v3553_v54  ;;  %v1434_v36 = vrot.slane %v1338_v8, 1  ;;  %v1582_v8 = vmul.f32 %v3481_v62, %v3551_v49 }
  0xb2   : > { %5259 = vst [vmem:[#allocation34_spill] sm:$0xff] %v3731_v27  ;;  %5260 = vst [vmem:[#allocation35_spill] sm:$0xff] %v3735_v15  ;;  %v544_v23 = vsel %vm509_vm0, %v3384_v19, %v454_v26  ;;  %v3756_v10 = vunpack.c.l.bf16 %v548_v50  ;;  %v1679_v54 = vrot.slane %v1583_v44, 2  ;;  %v1899_v44 = vmul.f32 %v3493_v0, %v3628_v3 }
  0xb3   : > { %5261 = vst [vmem:[#allocation36_spill] sm:$0xff] %v3739_v40  ;;  %5262 = vst [vmem:[#allocation37_spill] sm:$0xff] %v3743_v52  ;;  %v3758_v52 = vunpack.c.l.bf16 %v544_v23  ;;  %v3760_v14 = vunpack.c.h.bf16 %v544_v23  ;;  %v1435_v60 = vrot.slane %v1339_v17, 1  ;;  %v1897_v40 = vmul.f32 %v3493_v0, %v3656_v1 }
  0xb4   : > { %5264 = vst [vmem:[#allocation39_spill] sm:$0xff] %v3756_v10  ;;  %v3766_v19 = vmul.f32 %v3473_v57, %v3756_v10  ;;  %v3770_v26 = vmul.f32 %v3477_v59, %v3756_v10  ;;  %v3774_v50 = vmul.f32 %v3479_v61, %v3756_v10  ;;  %v3778_v23 = vmul.f32 %v3481_v62, %v3756_v10 }
  0xb5   : > { %5265 = vst [vmem:[#allocation40_spill] sm:$0xff] %v3758_v52  ;;  %5266 = vst [vmem:[#allocation41_spill] sm:$0xff] %v3760_v14  ;;  %v1829_v10 = vmul.f32 %v3491_v29, %v3658_v39  ;;  %v1436_v17 = vsel %vm873_vm1, %v1434_v36, %v1435_v60  ;;  %v1678_v14 = vrot.slane %v1582_v8, 2  ;;  %v3798_v52 = vld [vmem:[%s5158_s1 + $0x8] ss:$0 sm:$0xff] }
  0xb6   : > { %5267 = vst [vmem:[#allocation42_spill] sm:$0xff] %v3766_v19  ;;  %5268 = vst [vmem:[#allocation43_spill] sm:$0xff] %v3770_v26  ;;  %v1546_v15 = vadd.f32 %v1436_v17, %v1301_v30  ;;  %v1898_v26 = vmul.f32 %v3493_v0, %v3658_v39  ;;  %v488_v30 = vpop.permute.xlu1 %487  ;;  %v1993_v17 = vrot.slane %v1897_v40, 1  ;;  %v1996_v19 = vrot.slane %v1899_v44, 1 }
  0xb7   : > { %5269 = vst [vmem:[#allocation44_spill] sm:$0xff] %v3774_v50  ;;  %5270 = vst [vmem:[#allocation45_spill] sm:$0xff] %v3778_v23  ;;  %v5271_v23 = vrot.slane %v3573_v46, 1  ;;  %v1680_v36 = vsel %vm1118_vm2, %v1678_v14, %v1679_v54  ;;  %v5272_v46 = vrot.slane %v3576_v6, 2  ;;  %v2142_v50 = vmul.f32 %v3798_v52, %v3658_v39 }
  0xb8   : > { %v2143_v6 = vmul.f32 %v3798_v52, %v3628_v3  ;;  %v612_v48 = vsel %vm509_vm0, %v3392_v21, %v488_v30  ;;  %v5273_v44 = vrot.slane %v3525_v55, 1  ;;  %v3832_v21 = vld [vmem:[%s5159_s2] ss:$0 sm:$0xff] }
  0xb9   : > { %v1438_v49 = vsel %vm873_vm1, %v1435_v60, %v5271_v23  ;;  %v1682_v60 = vsel %vm1118_vm2, %v1679_v54, %v5272_v46  ;;  %v2141_v23 = vmul.f32 %v3798_v52, %v3656_v1  ;;  %v486_v54 = vpop.permute.xlu0 %485 }
  0xba   : > { %v1547_v27 = vadd.f32 %v1438_v49, %v1302_v28  ;;  %v1790_v28 = vadd.f32 %v1680_v36, %v1546_v15  ;;  %v1994_v49 = vrot.slane %v1898_v26, 1  ;;  %v2238_v15 = vrot.slane %v2142_v50, 2 }
  0xbb   : > { %v2237_v14 = vrot.slane %v2141_v23, 2  ;;  %v2240_v40 = vrot.slane %v2143_v6, 2  ;;  %v3820_v26 = vunpack.c.l.bf16 %v612_v48  ;;  %v608_v3 = vsel %vm509_vm0, %v3397_v22, %v486_v54 }
  0xbc   : > { %v1791_v8 = vadd.f32 %v1682_v60, %v1547_v27  ;;  %v1860_v46 = vadd.f32 %v1828_v56, %v1790_v28  ;;  %v1995_v9 = vsel %vm873_vm1, %v1993_v17, %v1994_v49  ;;  %v1997_v27 = vsel %vm873_vm1, %v1994_v49, %v1996_v19 }
  0xbd   : > { %v2239_v19 = vsel %vm1118_vm2, %v2237_v14, %v2238_v15  ;;  %v2241_v48 = vsel %vm1118_vm2, %v2238_v15, %v2240_v40  ;;  %v3842_v22 = vmul.f32 %v3477_v59, %v3820_v26  ;;  %v3850_v50 = vmul.f32 %v3481_v62, %v3820_v26 }
  0xbe   : > { %v1861_v32 = vadd.f32 %v1829_v10, %v1791_v8  ;;  %v2105_v36 = vadd.f32 %v1995_v9, %v1860_v46  ;;  %v5274_v10 = vrot.slane %v3507_v35, 1  ;;  %v3846_v9 = vmul.f32 %v3479_v61, %v3820_v26 }
  0xbf   : > { %v3854_v28 = vunpack.c.l.bf16 %v608_v3  ;;  %v3856_v8 = vunpack.c.h.bf16 %v608_v3  ;;  %v1002_v14 = vadd.f32 %v3563_v4, %v3497_v33  ;;  %v1046_v46 = vmul.f32 %v3477_v59, %v3483_v63 }
  0xc0   : > { %v2106_v60 = vadd.f32 %v1997_v27, %v1861_v32  ;;  %v918_v56 = vsel %vm873_vm1, %v5274_v10, %v5273_v44  ;;  %v3838_v32 = vmul.f32 %v3473_v57, %v3820_v26  ;;  %v2349_v35 = vadd.f32 %v2239_v19, %v2105_v36 }
  0xc1   : > { %v1003_v54 = vadd.f32 %v918_v56, %v3501_v34  ;;  %v1047_v27 = vmul.f32 %v3477_v59, %v3485_v16  ;;  %v1285_v15 = vmul.f32 %v3489_v20, %v3611_v51  ;;  %v1362_v3 = vmul.f32 %v3479_v61, %v3611_v51 }
  0xc2   : > { %v2350_v55 = vadd.f32 %v2241_v48, %v2106_v60  ;;  %v2387_v17 = vadd.f32 %v3832_v21, %v2349_v35  ;;  %v1286_v60 = vmul.f32 %v3489_v20, %v3615_v53  ;;  %v1159_v33 = vrot.slane %v1046_v46, 2 }
  0xc3   : > { %v1160_v4 = vrot.slane %v1047_v27, 2  ;;  %v1363_v34 = vmul.f32 %v3479_v61, %v3615_v53  ;;  %v1364_v44 = vmul.f32 %v3479_v61, %v3609_v5  ;;  %v1474_v56 = vrot.slane %v1362_v3, 1 }
  0xc4   : > { %v2388_v49 = vadd.f32 %v3832_v21, %v2350_v55  ;;  %v2419_v40 = vmax.f32 %v2387_v17, 0.0  ;;  %v1606_v19 = vmul.f32 %v3481_v62, %v3611_v51  ;;  %v1607_v48 = vmul.f32 %v3481_v62, %v3615_v53 }
  0xc5   : > { %v1161_v35 = vsel %vm1118_vm2, %v1159_v33, %v1160_v4  ;;  %v5275_v55 = vrot.slane %v3529_v2, 2  ;;  %v1477_v46 = vrot.slane %v1364_v44, 1  ;;  %v1844_v33 = vmul.f32 %v3491_v29, %v3664_v31 }
  0xc6   : > { %v2420_v36 = vmax.f32 %v2388_v49, 0.0  ;;  %v1475_v49 = vrot.slane %v1363_v34, 1  ;;  %v1247_v27 = vadd.f32 %v1161_v35, %v1002_v14  ;;  %v1719_v6 = vrot.slane %v1607_v48, 2 }
  0xc7   : > { %v1163_v17 = vsel %vm1118_vm2, %v1160_v4, %v5275_v55  ;;  %v1845_v34 = vmul.f32 %v3491_v29, %v3667_v41  ;;  %v1922_v44 = vmul.f32 %v3493_v0, %v3667_v41 }
  0xc8   : > { %v2451_v10 = vpack.c.bf16 %v2420_v36, %v2419_v40  ;;  %v1248_v30 = vadd.f32 %v1163_v17, %v1003_v54  ;;  %v1608_v40 = vmul.f32 %v3481_v62, %v3609_v5  ;;  %v1718_v36 = vrot.slane %v1606_v19, 2 }
  0xc9   : > { %v1476_v3 = vsel %vm873_vm1, %v1474_v56, %v1475_v49  ;;  %v1478_v23 = vsel %vm873_vm1, %v1475_v49, %v1477_v46  ;;  %v1317_v2 = vadd.f32 %v1285_v15, %v1247_v27  ;;  %v1921_v54 = vmul.f32 %v3493_v0, %v3664_v31 }
  0xca   : > { %2953 = vmatprep.mubr.bf16.mxu0 %v2451_v10  ;;  %v1318_v16 = vadd.f32 %v1286_v60, %v1248_v30  ;;  %v1721_v4 = vrot.slane %v1608_v40, 2  ;;  %v1720_v14 = vsel %vm1118_vm2, %v1718_v36, %v1719_v6  ;;  %v1923_v10 = vmul.f32 %v3493_v0, %v3662_v47  ;;  %v460_v60 = vpop.permute.xlu1 %459  ;;  %v458_v36 = vpop.permute.xlu0 %457 }
  0xcb   : > { %v1562_v56 = vadd.f32 %v1476_v3, %v1317_v2  ;;  %v2165_v30 = vmul.f32 %v3798_v52, %v3664_v31  ;;  %v2033_v48 = vrot.slane %v1921_v54, 1  ;;  %v2034_v35 = vrot.slane %v1922_v44, 1 }
  0xcc   : > { %v1563_v19 = vadd.f32 %v1478_v23, %v1318_v16  ;;  %v1722_v15 = vsel %vm1118_vm2, %v1719_v6, %v1721_v4  ;;  %v2036_v55 = vrot.slane %v1923_v10, 1  ;;  %v2166_v17 = vmul.f32 %v3798_v52, %v3667_v41 }
  0xcd   : > { %v1806_v49 = vadd.f32 %v1720_v14, %v1562_v56  ;;  %v2167_v27 = vmul.f32 %v3798_v52, %v3662_v47  ;;  %v2277_v40 = vrot.slane %v2165_v30, 2  ;;  %v2035_v16 = vsel %vm873_vm1, %v2033_v48, %v2034_v35 }
  0xce   : > { %v1807_v46 = vadd.f32 %v1722_v15, %v1563_v19  ;;  %v2037_v23 = vsel %vm873_vm1, %v2034_v35, %v2036_v55  ;;  %v2278_v6 = vrot.slane %v2166_v17, 2  ;;  %v556_v3 = vsel %vm509_vm0, %v3405_v24, %v460_v60 }
  0xcf   : > { %v1876_v2 = vadd.f32 %v1844_v33, %v1806_v49  ;;  %v2280_v54 = vrot.slane %v2167_v27, 2  ;;  %v3912_v44 = vunpack.c.l.bf16 %v556_v3  ;;  %v552_v47 = vsel %vm509_vm0, %v3410_v25, %v458_v36 }
  0xd0   : > { %v1877_v4 = vadd.f32 %v1845_v34, %v1807_v46  ;;  %v2279_v14 = vsel %vm1118_vm2, %v2277_v40, %v2278_v6  ;;  %v5276_v10 = vrot.slane %v3598_v42, 1  ;;  %v5277_v56 = vrot.slane %v3592_v38, 1 }
  0xd1   : > { %v5278_v15 = vrot.slane %v3567_v58, 1  ;;  %v2121_v34 = vadd.f32 %v2035_v16, %v1876_v2  ;;  %v2281_v60 = vsel %vm1118_vm2, %v2278_v6, %v2280_v54  ;;  %v3930_v48 = vmul.f32 %v3473_v57, %v3912_v44 }
  0xd2   : > { %v881_v19 = vsel %vm873_vm1, %v5277_v56, %v5276_v10  ;;  %v5279_v24 = vmov %v5276_v10  ;;  %v2122_v30 = vadd.f32 %v2037_v23, %v1877_v4  ;;  %v3934_v25 = vmul.f32 %v3477_v59, %v3912_v44 }
  0xd3   : > { %v883_v33 = vsel %vm873_vm1, %v5279_v24, %v5278_v15  ;;  %5280 = vst [vmem:[#allocation46_spill] sm:$0xff] %v3930_v48  ;;  %v3938_v38 = vmul.f32 %v3479_v61, %v3912_v44  ;;  %v3942_v58 = vmul.f32 %v3481_v62, %v3912_v44  ;;  %v3944_v42 = vunpack.c.l.bf16 %v552_v47 }
  0xd4   : > { %5281 = vst [vmem:[#allocation47_spill] sm:$0xff] %v3934_v25  ;;  %v2365_v35 = vadd.f32 %v2279_v14, %v2121_v34  ;;  %v2366_v55 = vadd.f32 %v2281_v60, %v2122_v30  ;;  %v3947_v49 = vunpack.c.h.bf16 %v552_v47  ;;  %v988_v40 = vadd.f32 %v881_v19, %v3580_v7 }
  0xd5   : > { %v989_v36 = vadd.f32 %v883_v33, %v3584_v37  ;;  %v5282_v6 = vrot.slane %v3607_v45, 2  ;;  %v5283_v3 = vrot.slane %v3602_v43, 2  ;;  %v5284_v4 = vrot.slane %v3570_v18, 2 }
  0xd6   : > { %v2403_v16 = vadd.f32 %v3832_v21, %v2365_v35  ;;  %v2404_v23 = vadd.f32 %v3832_v21, %v2366_v55  ;;  %v1271_v37 = vmul.f32 %v3489_v20, %v3656_v1  ;;  %v1272_v10 = vmul.f32 %v3489_v20, %v3658_v39 }
  0xd7   : > { %v1126_v2 = vsel %vm1118_vm2, %v5283_v3, %v5282_v6  ;;  %v5285_v54 = vmov %v5282_v6  ;;  %v1341_v43 = vmul.f32 %v3479_v61, %v3656_v1  ;;  %v1342_v18 = vmul.f32 %v3479_v61, %v3658_v39 }
  0xd8   : > { %v1128_v14 = vsel %vm1118_vm2, %v5285_v54, %v5284_v4  ;;  %v1233_v47 = vadd.f32 %v1126_v2, %v988_v40  ;;  %v2435_v56 = vmax.f32 %v2403_v16, 0.0  ;;  %v2436_v19 = vmax.f32 %v2404_v23, 0.0  ;;  %v5287_v23 = vld [vmem:[#allocation28_spill] sm:$0xff]  ;;  %v5288_v2 = vld [vmem:[#allocation22_spill] sm:$0xff] }
  0xd9   : > { %v1234_v7 = vadd.f32 %v1128_v14, %v989_v36  ;;  %v1585_v24 = vmul.f32 %v3481_v62, %v3656_v1  ;;  %v1586_v33 = vmul.f32 %v3481_v62, %v3658_v39  ;;  %v1439_v30 = vrot.slane %v1341_v43, 1  ;;  %v5286_v36 = vld [vmem:[#allocation27_spill] sm:$0xff] }
  0xda   : > { %v1303_v15 = vadd.f32 %v1271_v37, %v1233_v47  ;;  %v2459_v34 = vpack.c.bf16 %v2436_v19, %v2435_v56  ;;  %v1440_v60 = vrot.slane %v1342_v18, 1  ;;  %v1686_v35 = vrot.slane %v3654_v11, 2  ;;  %v492_v56 = vpop.permute.xlu1 %491 }
  0xdb   : > { %v1304_v45 = vadd.f32 %v1272_v10, %v1234_v7  ;;  %v1683_v55 = vrot.slane %v1585_v24, 2  ;;  %v1684_v40 = vrot.slane %v1586_v33, 2  ;;  %v1830_v16 = vmul.f32 %v3491_v29, %v5286_v36 }
  0xdc   : > { %v1831_v6 = vmul.f32 %v3491_v29, %v5287_v23  ;;  %2969 = vmatprep.mubr.bf16.mxu1 %v2459_v34  ;;  %v1441_v3 = vsel %vm873_vm1, %v1439_v30, %v1440_v60  ;;  %v5289_v4 = vrot.slane %v5288_v2, 1  ;;  %v1900_v14 = vmul.f32 %v3493_v0, %v5286_v36 }
  0xdd   : > { %v1901_v11 = vmul.f32 %v3493_v0, %v5287_v23  ;;  %v1548_v47 = vadd.f32 %v1441_v3, %v1303_v15  ;;  %v1685_v37 = vsel %vm1118_vm2, %v1683_v55, %v1684_v40  ;;  %v1687_v10 = vsel %vm1118_vm2, %v1684_v40, %v1686_v35  ;;  %v5290_v40 = vld [vmem:[#allocation5_spill] sm:$0xff] }
  0xde   : > { %v1443_v54 = vsel %vm873_vm1, %v1440_v60, %v5289_v4  ;;  %v1902_v19 = vmul.f32 %v3493_v0, %v3689_v12  ;;  %v1998_v43 = vrot.slane %v1900_v14, 1  ;;  %v2144_v24 = vmul.f32 %v3798_v52, %v5286_v36 }
  0xdf   : > { %v1549_v7 = vadd.f32 %v1443_v54, %v1304_v45  ;;  %v1999_v18 = vrot.slane %v1901_v11, 1  ;;  %v1792_v33 = vadd.f32 %v1685_v37, %v1548_v47  ;;  %v2145_v30 = vmul.f32 %v3798_v52, %v5287_v23  ;;  %v490_v45 = vpop.permute.xlu0 %489 }
  0xe0   : > { %v2146_v15 = vmul.f32 %v3798_v52, %v3689_v12  ;;  %v2001_v35 = vrot.slane %v1902_v19, 1  ;;  %v2242_v55 = vrot.slane %v2144_v24, 2  ;;  %v620_v3 = vsel %vm509_vm0, %v5290_v40, %v492_v56  ;;  %v5292_v12 = vld [vmem:[#allocation9_spill] sm:$0xff] }
  0xe1   : > { %v1793_v34 = vadd.f32 %v1687_v10, %v1549_v7  ;;  %v2000_v60 = vsel %vm873_vm1, %v1998_v43, %v1999_v18  ;;  %v1862_v2 = vadd.f32 %v1830_v16, %v1792_v33  ;;  %v2243_v54 = vrot.slane %v2145_v30, 2  ;;  %v5291_v7 = vld [vmem:[#allocation6_spill] sm:$0xff] }
  0xe2   : > { %v2245_v14 = vrot.slane %v2146_v15, 2  ;;  %v2002_v11 = vsel %vm873_vm1, %v1999_v18, %v2001_v35  ;;  %v4004_v47 = vunpack.c.l.bf16 %v620_v3  ;;  %v616_v37 = vsel %vm509_vm0, %v5291_v7, %v490_v45 }
  0xe3   : > { %v1863_v4 = vadd.f32 %v1831_v6, %v1793_v34  ;;  %v711_v10 = vmul.f32 %v5292_v12, %v3611_v51  ;;  %v2107_v43 = vadd.f32 %v2000_v60, %v1862_v2  ;;  %v2244_v24 = vsel %vm1118_vm2, %v2242_v55, %v2243_v54  ;;  %v5297_v55 = vld [vmem:[#allocation18_spill] sm:$0xff] }
  0xe4   : > { %v2246_v56 = vsel %vm1118_vm2, %v2243_v54, %v2245_v14  ;;  %v4014_v16 = vmul.f32 %v3473_v57, %v4004_v47  ;;  %v4018_v6 = vmul.f32 %v3477_v59, %v4004_v47  ;;  %v4022_v18 = vmul.f32 %v3479_v61, %v4004_v47 }
  0xe5   : > { %v2108_v19 = vadd.f32 %v2002_v11, %v1863_v4  ;;  %v4026_v33 = vmul.f32 %v3481_v62, %v4004_v47  ;;  %v2351_v34 = vadd.f32 %v2244_v24, %v2107_v43  ;;  %v4028_v15 = vunpack.c.l.bf16 %v616_v37 }
  0xe6   : > { %5293 = vst [vmem:[#allocation27_spill] sm:$0xff] %v4014_v16  ;;  %5294 = vst [vmem:[#allocation28_spill] sm:$0xff] %v4018_v6  ;;  %v4030_v45 = vunpack.c.h.bf16 %v616_v37  ;;  %v712_v40 = vmul.f32 %v5292_v12, %v3615_v53  ;;  %v804_v4 = vmul.f32 %v3473_v57, %v3611_v51  ;;  %v805_v54 = vmul.f32 %v3473_v57, %v3615_v53  ;;  %v5306_v16 = vld [vmem:[#allocation7_spill] sm:$0xff] }
  0xe7   : > { %5295 = vst [vmem:[#allocation22_spill] sm:$0xff] %v4022_v18  ;;  %5296 = vst [vmem:[#allocation5_spill] sm:$0xff] %v4026_v33  ;;  %v2352_v30 = vadd.f32 %v2246_v56, %v2108_v19  ;;  %v2389_v3 = vadd.f32 %v3832_v21, %v2351_v34  ;;  %v1049_v14 = vmul.f32 %v3477_v59, %v3611_v51  ;;  %v5298_v27 = vrot.slane %v5297_v55, 1  ;;  %v3104_v33 = vld [vmem:[%s3292_s11 + $0xb0] ss:$0 sps:$4 sm:$0x11]  }
  0xe8   : > { %v1050_v11 = vmul.f32 %v3477_v59, %v3615_v53  ;;  %v1287_v7 = vmul.f32 %v3489_v20, %v3664_v31  ;;  %v1288_v37 = vmul.f32 %v3489_v20, %v3667_v41  ;;  %v919_v24 = vrot.slane %v804_v4, 1  ;;  %v3105_v18 = vld [vmem:[%s3292_s11 + $0xa8] sm:$0xff]  }
  0xe9   : > { %v2390_v2 = vadd.f32 %v3832_v21, %v2352_v30  ;;  %v2421_v43 = vmax.f32 %v2389_v3, 0.0  ;;  %v920_v56 = vrot.slane %v805_v54, 1  ;;  %v1164_v34 = vrot.slane %v1049_v14, 2  ;;  %v5299_v14 = vld [vmem:[#allocation19_spill] sm:$0xff] }
  0xea   : > { %v1165_v30 = vrot.slane %v1050_v11, 2  ;;  %v1365_v35 = vmul.f32 %v3479_v61, %v3664_v31  ;;  %v1366_v60 = vmul.f32 %v3479_v61, %v3667_v41  ;;  %v1609_v3 = vmul.f32 %v3481_v62, %v3664_v31 }
  0xeb   : > { %v2422_v19 = vmax.f32 %v2390_v2, 0.0  ;;  %v921_v17 = vsel %vm873_vm1, %v919_v24, %v920_v56  ;;  %v923_v5 = vsel %vm873_vm1, %v920_v56, %v5298_v27  ;;  %v5300_v11 = vrot.slane %v5299_v14, 2  ;;  %v5301_v56 = vld [vmem:[#allocation26_spill] sm:$0xff] }
  0xec   : > { %v1004_v2 = vadd.f32 %v921_v17, %v711_v10  ;;  %v1005_v4 = vadd.f32 %v923_v5, %v712_v40  ;;  %v1166_v54 = vsel %vm1118_vm2, %v1164_v34, %v1165_v30  ;;  %v1479_v51 = vrot.slane %v1365_v35, 1  ;;  %v5302_v10 = vld [vmem:[#allocation25_spill] sm:$0xff]  ;;  %v5304_v35 = vld [vmem:[#allocation38_spill] sm:$0xff] }
  0xed   : > { %v2452_v46 = vpack.c.bf16 %v2422_v19, %v2421_v43  ;;  %v1168_v53 = vsel %vm1118_vm2, %v1165_v30, %v5300_v11  ;;  %v1480_v43 = vrot.slane %v1366_v60, 1  ;;  %v1610_v19 = vmul.f32 %v3481_v62, %v3667_v41 }
  0xee   : > { %v1723_v55 = vrot.slane %v1609_v3, 2  ;;  %v1249_v24 = vadd.f32 %v1166_v54, %v1004_v2  ;;  %v1250_v27 = vadd.f32 %v1168_v53, %v1005_v4  ;;  %v1726_v63 = vrot.slane %v5301_v56, 2  ;;  %v5305_v4 = vld [vmem:[#allocation33_spill] sm:$0xff] }
  0xef   : > { %2954 = vmatmul.mubr.bf16.vlgmr.msra.gmra.mrb[0].mxu0 %v2452_v46  ;;  %v1846_v5 = vmul.f32 %v3491_v29, %v3727_v13  ;;  %v1481_v17 = vsel %vm873_vm1, %v1479_v51, %v1480_v43  ;;  %v5303_v40 = vrot.slane %v5302_v10, 1  ;;  %v1724_v46 = vrot.slane %v1610_v19, 2 }
  0xf0   : > { %v1847_v60 = vmul.f32 %v3491_v29, %v5304_v35  ;;  %v1319_v30 = vadd.f32 %v1287_v7, %v1249_v24  ;;  %v1320_v14 = vadd.f32 %v1288_v37, %v1250_v27  ;;  %v1924_v53 = vmul.f32 %v3493_v0, %v3727_v13 }
  0xf1   : > { %v1483_v34 = vsel %vm873_vm1, %v1480_v43, %v5303_v40  ;;  %v1925_v3 = vmul.f32 %v3493_v0, %v5304_v35  ;;  %v1725_v2 = vsel %vm1118_vm2, %v1723_v55, %v1724_v46  ;;  %v1727_v51 = vsel %vm1118_vm2, %v1724_v46, %v1726_v63  ;;  %v464_v43 = vpop.permute.xlu1 %463  ;;  %v462_v63 = vpop.permute.xlu0 %461 }
  0xf2   : > { %v1926_v54 = vmul.f32 %v3493_v0, %v5305_v4  ;;  %v2168_v11 = vmul.f32 %v3798_v52, %v3727_v13  ;;  %v1564_v19 = vadd.f32 %v1481_v17, %v1319_v30  ;;  %v1565_v7 = vadd.f32 %v1483_v34, %v1320_v14 }
  0xf3   : > { %v2038_v37 = vrot.slane %v1924_v53, 1  ;;  %v2039_v24 = vrot.slane %v1925_v3, 1  ;;  %v2169_v56 = vmul.f32 %v3798_v52, %v5304_v35  ;;  %v2170_v55 = vmul.f32 %v3798_v52, %v5305_v4 }
  0xf4   : > { %v2041_v27 = vrot.slane %v1926_v54, 1  ;;  %v2282_v10 = vrot.slane %v2168_v11, 2  ;;  %v1808_v40 = vadd.f32 %v1725_v2, %v1564_v19  ;;  %v1809_v46 = vadd.f32 %v1727_v51, %v1565_v7  ;;  %v5307_v54 = vld [vmem:[#allocation8_spill] sm:$0xff] }
  0xf5   : > { %v2040_v6 = vsel %vm873_vm1, %v2038_v37, %v2039_v24  ;;  %v564_v25 = vsel %vm509_vm0, %v5306_v16, %v464_v43  ;;  %v2283_v34 = vrot.slane %v2169_v56, 2  ;;  %v2285_v30 = vrot.slane %v2170_v55, 2 }
  0xf6   : > { %v2042_v17 = vsel %vm873_vm1, %v2039_v24, %v2041_v27  ;;  %v4094_v14 = vunpack.c.l.bf16 %v564_v25  ;;  %v1878_v53 = vadd.f32 %v1846_v5, %v1808_v40  ;;  %v1879_v3 = vadd.f32 %v1847_v60, %v1809_v46 }
  0xf7   : > { %v560_v4 = vsel %vm509_vm0, %v5307_v54, %v462_v63  ;;  %v697_v2 = vmul.f32 %v5292_v12, %v3656_v1  ;;  %v2284_v51 = vsel %vm1118_vm2, %v2282_v10, %v2283_v34  ;;  %v2286_v11 = vsel %vm1118_vm2, %v2283_v34, %v2285_v30 }
  0xf8   : > { %v4104_v16 = vmul.f32 %v3473_v57, %v4094_v14  ;;  %v4108_v25 = vmul.f32 %v3477_v59, %v4094_v14  ;;  %v2123_v5 = vadd.f32 %v2040_v6, %v1878_v53  ;;  %v2124_v60 = vadd.f32 %v2042_v17, %v1879_v3 }
  0xf9   : > { %v4112_v43 = vmul.f32 %v3479_v61, %v4094_v14  ;;  %v4116_v19 = vmul.f32 %v3481_v62, %v4094_v14  ;;  %v4120_v24 = vunpack.c.l.bf16 %v560_v4  ;;  %v4122_v27 = vunpack.c.h.bf16 %v560_v4 }
  0xfa   : > { %5308 = vst [vmem:[#allocation6_spill] sm:$0xff] %v4104_v16  ;;  %5309 = vst [vmem:[#allocation9_spill] sm:$0xff] %v4108_v25  ;;  %v2367_v56 = vadd.f32 %v2284_v51, %v2123_v5  ;;  %v2368_v55 = vadd.f32 %v2286_v11, %v2124_v60  ;;  %v698_v10 = vmul.f32 %v5292_v12, %v3658_v39 }
  0xfb   : > { %5310 = vst [vmem:[#allocation18_spill] sm:$0xff] %v4112_v43  ;;  %5311 = vst [vmem:[#allocation19_spill] sm:$0xff] %v4116_v19  ;;  %v783_v63 = vmul.f32 %v3473_v57, %v3656_v1  ;;  %v784_v40 = vmul.f32 %v3473_v57, %v3658_v39  ;;  %v1028_v46 = vmul.f32 %v3477_v59, %v3656_v1 }
  0xfc   : > { %v1029_v17 = vmul.f32 %v3477_v59, %v3658_v39  ;;  %v2405_v34 = vadd.f32 %v3832_v21, %v2367_v56  ;;  %v2406_v30 = vadd.f32 %v3832_v21, %v2368_v55  ;;  %v1273_v53 = vmul.f32 %v3489_v20, %v5286_v36  ;;  %v5312_v55 = vld [vmem:[#allocation20_spill] sm:$0xff] }
  0xfd   : > { %v1274_v3 = vmul.f32 %v3489_v20, %v5287_v23  ;;  %v884_v54 = vrot.slane %v783_v63, 1  ;;  %v885_v4 = vrot.slane %v784_v40, 1  ;;  %v1129_v51 = vrot.slane %v1028_v46, 2  ;;  %v5314_v63 = vld [vmem:[#allocation21_spill] sm:$0xff] }
  0xfe   : > { %v1130_v11 = vrot.slane %v1029_v17, 2  ;;  %v2437_v5 = vmax.f32 %v2405_v34, 0.0  ;;  %v2438_v60 = vmax.f32 %v2406_v30, 0.0  ;;  %v1344_v1 = vmul.f32 %v3479_v61, %v5286_v36 }
  0xff   : > { %v1345_v39 = vmul.f32 %v3479_v61, %v5287_v23  ;;  %v886_v56 = vsel %vm873_vm1, %v884_v54, %v885_v4  ;;  %v5313_v37 = vrot.slane %v5312_v55, 1  ;;  %v5315_v40 = vrot.slane %v5314_v63, 2  ;;  %v5316_v55 = vld [vmem:[#allocation32_spill] sm:$0xff] }
 0x100   : > { %v1131_v6 = vsel %vm1118_vm2, %v1129_v51, %v1130_v11  ;;  %v2460_v17 = vpack.c.bf16 %v2438_v60, %v2437_v5  ;;  %v990_v34 = vadd.f32 %v886_v56, %v697_v2  ;;  %v1444_v25 = vrot.slane %v1344_v1, 1  ;;  %v5317_v51 = vld [vmem:[#allocation40_spill] sm:$0xff] }
 0x101   : > { %v888_v7 = vsel %vm873_vm1, %v885_v4, %v5313_v37  ;;  %v1133_v46 = vsel %vm1118_vm2, %v1130_v11, %v5315_v40  ;;  %v1445_v16 = vrot.slane %v1345_v39, 1  ;;  %v1588_v43 = vmul.f32 %v3481_v62, %v5286_v36  ;;  %v5318_v11 = vld [vmem:[#allocation41_spill] sm:$0xff] }
 0x102   : > { %v991_v30 = vadd.f32 %v888_v7, %v698_v10  ;;  %v1589_v54 = vmul.f32 %v3481_v62, %v5287_v23  ;;  %v1691_v48 = vrot.slane %v5316_v55, 2  ;;  %2970 = vmatmul.mubr.bf16.vlgmr.msra.gmra.mrb[0].mxu1 %v2460_v17  ;;  %v1235_v37 = vadd.f32 %v1131_v6, %v990_v34  ;;  %v5319_v10 = vld [vmem:[#allocation31_spill] sm:$0xff] }
 0x103   : > { %v1832_v63 = vmul.f32 %v3491_v29, %v5317_v51  ;;  %v1833_v2 = vmul.f32 %v3491_v29, %v5318_v11  ;;  %v1446_v7 = vsel %vm873_vm1, %v1444_v25, %v1445_v16  ;;  %v5320_v5 = vrot.slane %v5319_v10, 1 }
 0x104   : > { %v1236_v4 = vadd.f32 %v1133_v46, %v991_v30  ;;  %v1688_v1 = vrot.slane %v1588_v43, 2  ;;  %v1689_v39 = vrot.slane %v1589_v54, 2  ;;  %v1305_v56 = vadd.f32 %v1273_v53, %v1235_v37  ;;  %v5321_v30 = vld [vmem:[#allocation39_spill] sm:$0xff]  ;;  %v496_v43 = vpop.permute.xlu1 %495 }
 0x105   : > { %v1448_v60 = vsel %vm873_vm1, %v1445_v16, %v5320_v5  ;;  %v1903_v6 = vmul.f32 %v3493_v0, %v5317_v51  ;;  %v1904_v46 = vmul.f32 %v3493_v0, %v5318_v11  ;;  %v1905_v25 = vmul.f32 %v3493_v0, %v5321_v30  ;;  %v494_v5 = vpop.permute.xlu0 %493 }
 0x106   : > { %v1306_v40 = vadd.f32 %v1274_v3, %v1236_v4  ;;  %v1690_v17 = vsel %vm1118_vm2, %v1688_v1, %v1689_v39  ;;  %v1692_v34 = vsel %vm1118_vm2, %v1689_v39, %v1691_v48  ;;  %v2147_v16 = vmul.f32 %v3798_v52, %v5317_v51 }
 0x107   : > { %v1550_v53 = vadd.f32 %v1446_v7, %v1305_v56  ;;  %v2003_v54 = vrot.slane %v1903_v6, 1  ;;  %v2004_v55 = vrot.slane %v1904_v46, 1  ;;  %v2006_v37 = vrot.slane %v1905_v25, 1 }
 0x108   : > { %v1551_v3 = vadd.f32 %v1448_v60, %v1306_v40  ;;  %v2148_v4 = vmul.f32 %v3798_v52, %v5318_v11  ;;  %v2149_v48 = vmul.f32 %v3798_v52, %v5321_v30  ;;  %v2247_v10 = vrot.slane %v2147_v16, 2 }
 0x109   : > { %v1794_v1 = vadd.f32 %v1690_v17, %v1550_v53  ;;  %v2005_v19 = vsel %vm873_vm1, %v2003_v54, %v2004_v55  ;;  %v628_v7 = vsel %vm509_vm0, %v3104_v33, %v496_v43  ;;  %v2007_v60 = vsel %vm873_vm1, %v2004_v55, %v2006_v37 }
 0x10a   : > { %v1795_v39 = vadd.f32 %v1692_v34, %v1551_v3  ;;  %v2248_v56 = vrot.slane %v2148_v4, 2  ;;  %v2250_v40 = vrot.slane %v2149_v48, 2  ;;  %v4184_v6 = vunpack.c.l.bf16 %v628_v7 }
 0x10b   : > { %v1864_v46 = vadd.f32 %v1832_v63, %v1794_v1  ;;  %v624_v30 = vsel %vm509_vm0, %v3105_v18, %v494_v5  ;;  %v713_v17 = vmul.f32 %v5292_v12, %v3664_v31  ;;  %v807_v5 = vmul.f32 %v3473_v57, %v3664_v31 }
 0x10c   : > { %v1865_v25 = vadd.f32 %v1833_v2, %v1795_v39  ;;  %v2249_v34 = vsel %vm1118_vm2, %v2247_v10, %v2248_v56  ;;  %v2251_v16 = vsel %vm1118_vm2, %v2248_v56, %v2250_v40  ;;  %v4194_v33 = vmul.f32 %v3473_v57, %v4184_v6 }
 0x10d   : > { %v4198_v43 = vmul.f32 %v3477_v59, %v4184_v6  ;;  %v2109_v63 = vadd.f32 %v2005_v19, %v1864_v46  ;;  %v4202_v18 = vmul.f32 %v3479_v61, %v4184_v6  ;;  %v4206_v53 = vmul.f32 %v3481_v62, %v4184_v6 }
 0x10e   : > { %5322 = vst [vmem:[#allocation26_spill] sm:$0xff] %v4194_v33  ;;  %v2110_v2 = vadd.f32 %v2007_v60, %v1865_v25  ;;  %v4210_v55 = vunpack.c.l.bf16 %v624_v30  ;;  %v4212_v37 = vunpack.c.h.bf16 %v624_v30  ;;  %v714_v10 = vmul.f32 %v5292_v12, %v3667_v41 }
 0x10f   : > { %5323 = vst [vmem:[#allocation25_spill] sm:$0xff] %v4198_v43  ;;  %5324 = vst [vmem:[#allocation38_spill] sm:$0xff] %v4202_v18  ;;  %v2353_v4 = vadd.f32 %v2249_v34, %v2109_v63  ;;  %v808_v1 = vmul.f32 %v3473_v57, %v3667_v41  ;;  %v1052_v39 = vmul.f32 %v3477_v59, %v3664_v31  ;;  %v924_v25 = vrot.slane %v807_v5, 1  ;;  %v5328_v5 = vld [vmem:[#allocation24_spill] sm:$0xff] }
 0x110   : > { %5325 = vst [vmem:[#allocation33_spill] sm:$0xff] %v4206_v53  ;;  %v2354_v48 = vadd.f32 %v2251_v16, %v2110_v2  ;;  %v1053_v7 = vmul.f32 %v3477_v59, %v3667_v41  ;;  %v1289_v40 = vmul.f32 %v3489_v20, %v3727_v13  ;;  %v1290_v46 = vmul.f32 %v3489_v20, %v5304_v35 }
 0x111   : > { %v2391_v60 = vadd.f32 %v3832_v21, %v2353_v4  ;;  %v925_v30 = vrot.slane %v808_v1, 1  ;;  %v1169_v34 = vrot.slane %v1052_v39, 2  ;;  %v1368_v31 = vmul.f32 %v3479_v61, %v3727_v13 }
 0x112   : > { %v2392_v56 = vadd.f32 %v3832_v21, %v2354_v48  ;;  %v1170_v16 = vrot.slane %v1053_v7, 2  ;;  %v1369_v41 = vmul.f32 %v3479_v61, %v5304_v35  ;;  %v5326_v48 = vld [vmem:[#allocation23_spill] sm:$0xff]  ;;  %v5329_v1 = vrot.slane %v5328_v5, 2 }
 0x113   : > { %v2423_v63 = vmax.f32 %v2391_v60, 0.0  ;;  %v926_v4 = vsel %vm873_vm1, %v924_v25, %v925_v30  ;;  %v5327_v54 = vrot.slane %v5326_v48, 1  ;;  %v1484_v43 = vrot.slane %v1368_v31, 1  ;;  %v5330_v48 = vld [vmem:[#allocation37_spill] sm:$0xff] }
 0x114   : > { %v2424_v2 = vmax.f32 %v2392_v56, 0.0  ;;  %v1171_v19 = vsel %vm1118_vm2, %v1169_v34, %v1170_v16  ;;  %v1173_v39 = vsel %vm1118_vm2, %v1170_v16, %v5329_v1  ;;  %v1006_v60 = vadd.f32 %v926_v4, %v713_v17 }
 0x115   : > { %v928_v3 = vsel %vm873_vm1, %v925_v30, %v5327_v54  ;;  %v1485_v33 = vrot.slane %v1369_v41, 1  ;;  %v1612_v53 = vmul.f32 %v3481_v62, %v3727_v13  ;;  %v1613_v25 = vmul.f32 %v3481_v62, %v5304_v35 }
 0x116   : > { %v2453_v7 = vpack.c.bf16 %v2424_v2, %v2423_v63  ;;  %v1007_v56 = vadd.f32 %v928_v3, %v714_v10  ;;  %v1731_v18 = vrot.slane %v5330_v48, 2  ;;  %v1251_v54 = vadd.f32 %v1171_v19, %v1006_v60  ;;  %v5331_v10 = vld [vmem:[#allocation36_spill] sm:$0xff] }
 0x117   : > { %v1848_v34 = vmul.f32 %v3491_v29, %v3854_v28  ;;  %v1849_v17 = vmul.f32 %v3491_v29, %v3856_v8  ;;  %v1486_v3 = vsel %vm873_vm1, %v1484_v43, %v1485_v33  ;;  %v5332_v16 = vrot.slane %v5331_v10, 1 }
 0x118   : > { %2957 = vmatprep.mubr.bf16.mxu0 %v2453_v7  ;;  %v1252_v30 = vadd.f32 %v1173_v39, %v1007_v56  ;;  %v1728_v2 = vrot.slane %v1612_v53, 2  ;;  %v1729_v31 = vrot.slane %v1613_v25, 2  ;;  %v1321_v41 = vadd.f32 %v1289_v40, %v1251_v54  ;;  %v468_v53 = vpop.permute.xlu1 %467  ;;  %v466_v54 = vpop.permute.xlu0 %465 }
 0x119   : > { %v1488_v63 = vsel %vm873_vm1, %v1485_v33, %v5332_v16  ;;  %v1927_v19 = vmul.f32 %v3493_v0, %v3854_v28  ;;  %v1928_v5 = vmul.f32 %v3493_v0, %v3856_v8  ;;  %v1929_v43 = vmul.f32 %v3493_v0, %v3820_v26 }
 0x11a   : > { %v1322_v4 = vadd.f32 %v1290_v46, %v1252_v30  ;;  %v1730_v1 = vsel %vm1118_vm2, %v1728_v2, %v1729_v31  ;;  %v1732_v39 = vsel %vm1118_vm2, %v1729_v31, %v1731_v18  ;;  %v2171_v33 = vmul.f32 %v3798_v52, %v3854_v28  ;;  %v3106_v2 = vld [vmem:[%s3292_s11 + $0x5c] ss:$0 sps:$4 sm:$0x11]  }
 0x11b   : > { %v1566_v40 = vadd.f32 %v1486_v3, %v1321_v41  ;;  %v2043_v7 = vrot.slane %v1927_v19, 1  ;;  %v2044_v60 = vrot.slane %v1928_v5, 1  ;;  %v2046_v56 = vrot.slane %v1929_v43, 1  ;;  %v3107_v43 = vld [vmem:[%s3292_s11 + $0x54] sm:$0xff]  }
 0x11c   : > { %v1567_v46 = vadd.f32 %v1488_v63, %v1322_v4  ;;  %v2172_v25 = vmul.f32 %v3798_v52, %v3856_v8  ;;  %v2173_v18 = vmul.f32 %v3798_v52, %v3820_v26  ;;  %v2287_v48 = vrot.slane %v2171_v33, 2 }
 0x11d   : > { %v1810_v30 = vadd.f32 %v1730_v1, %v1566_v40  ;;  %v2045_v16 = vsel %vm873_vm1, %v2043_v7, %v2044_v60  ;;  %v572_v3 = vsel %vm509_vm0, %v3106_v2, %v468_v53  ;;  %v2047_v63 = vsel %vm873_vm1, %v2044_v60, %v2046_v56 }
 0x11e   : > { %v1811_v10 = vadd.f32 %v1732_v39, %v1567_v46  ;;  %v2288_v31 = vrot.slane %v2172_v25, 2  ;;  %v2290_v41 = vrot.slane %v2173_v18, 2  ;;  %v4274_v4 = vunpack.c.l.bf16 %v572_v3 }
 0x11f   : > { %v1880_v19 = vadd.f32 %v1848_v34, %v1810_v30  ;;  %v568_v26 = vsel %vm509_vm0, %v3107_v43, %v466_v54  ;;  %v699_v1 = vmul.f32 %v5292_v12, %v5286_v36  ;;  %v787_v2 = vmul.f32 %v3473_v57, %v5287_v23 }
 0x120   : > { %v1881_v5 = vadd.f32 %v1849_v17, %v1811_v10  ;;  %v2289_v39 = vsel %vm1118_vm2, %v2287_v48, %v2288_v31  ;;  %v2291_v33 = vsel %vm1118_vm2, %v2288_v31, %v2290_v41  ;;  %v4284_v53 = vmul.f32 %v3473_v57, %v4274_v4 }
 0x121   : > { %v4288_v40 = vmul.f32 %v3477_v59, %v4274_v4  ;;  %v2125_v34 = vadd.f32 %v2045_v16, %v1880_v19  ;;  %v4292_v46 = vmul.f32 %v3479_v61, %v4274_v4  ;;  %v4296_v7 = vmul.f32 %v3481_v62, %v4274_v4 }
 0x122   : > { %5333 = vst [vmem:[#allocation7_spill] sm:$0xff] %v4284_v53  ;;  %v2126_v17 = vadd.f32 %v2047_v63, %v1881_v5  ;;  %v4300_v25 = vunpack.c.l.bf16 %v568_v26  ;;  %v4302_v18 = vunpack.c.h.bf16 %v568_v26  ;;  %v700_v10 = vmul.f32 %v5292_v12, %v5287_v23 }
 0x123   : > { %5334 = vst [vmem:[#allocation8_spill] sm:$0xff] %v4288_v40  ;;  %5335 = vst [vmem:[#allocation20_spill] sm:$0xff] %v4292_v46  ;;  %v2369_v48 = vadd.f32 %v2289_v39, %v2125_v34  ;;  %v786_v16 = vmul.f32 %v3473_v57, %v5286_v36  ;;  %v1031_v3 = vmul.f32 %v3477_v59, %v5286_v36  ;;  %v890_v26 = vrot.slane %v787_v2, 1 }
 0x124   : > { %5336 = vst [vmem:[#allocation21_spill] sm:$0xff] %v4296_v7  ;;  %v2370_v54 = vadd.f32 %v2291_v33, %v2126_v17  ;;  %v1032_v63 = vmul.f32 %v3477_v59, %v5287_v23  ;;  %v1275_v19 = vmul.f32 %v3489_v20, %v5317_v51  ;;  %v1276_v5 = vmul.f32 %v3489_v20, %v5318_v11 }
 0x125   : > { %v2407_v31 = vadd.f32 %v3832_v21, %v2369_v48  ;;  %v889_v43 = vrot.slane %v786_v16, 1  ;;  %v1134_v39 = vrot.slane %v1031_v3, 2  ;;  %v1347_v36 = vmul.f32 %v3479_v61, %v5317_v51  ;;  %v5339_v16 = vld [vmem:[#allocation30_spill] sm:$0xff] }
 0x126   : > { %v2408_v41 = vadd.f32 %v3832_v21, %v2370_v54  ;;  %v1135_v33 = vrot.slane %v1032_v63, 2  ;;  %v1348_v23 = vmul.f32 %v3479_v61, %v5318_v11  ;;  %v5337_v54 = vld [vmem:[#allocation29_spill] sm:$0xff]  ;;  %v5340_v2 = vrot.slane %v5339_v16, 2 }
 0x127   : > { %v2439_v34 = vmax.f32 %v2407_v31, 0.0  ;;  %v891_v48 = vsel %vm873_vm1, %v889_v43, %v890_v26  ;;  %v5338_v56 = vrot.slane %v5337_v54, 1  ;;  %v1449_v40 = vrot.slane %v1347_v36, 1  ;;  %v5341_v54 = vld [vmem:[#allocation45_spill] sm:$0xff] }
 0x128   : > { %v2440_v17 = vmax.f32 %v2408_v41, 0.0  ;;  %v1136_v30 = vsel %vm1118_vm2, %v1134_v39, %v1135_v33  ;;  %v1138_v3 = vsel %vm1118_vm2, %v1135_v33, %v5340_v2  ;;  %v992_v31 = vadd.f32 %v891_v48, %v699_v1 }
 0x129   : > { %v893_v60 = vsel %vm873_vm1, %v890_v26, %v5338_v56  ;;  %v1450_v53 = vrot.slane %v1348_v23, 1  ;;  %v1591_v7 = vmul.f32 %v3481_v62, %v5317_v51  ;;  %v1592_v43 = vmul.f32 %v3481_v62, %v5318_v11 }
 0x12a   : > { %v2461_v63 = vpack.c.bf16 %v2440_v17, %v2439_v34  ;;  %v993_v41 = vadd.f32 %v893_v60, %v700_v10  ;;  %v1696_v46 = vrot.slane %v5341_v54, 2  ;;  %v1237_v56 = vadd.f32 %v1136_v30, %v992_v31  ;;  %v5342_v10 = vld [vmem:[#allocation44_spill] sm:$0xff] }
 0x12b   : > { %v1834_v39 = vmul.f32 %v3491_v29, %v3944_v42  ;;  %v1835_v1 = vmul.f32 %v3491_v29, %v3947_v49  ;;  %v1451_v60 = vsel %vm873_vm1, %v1449_v40, %v1450_v53  ;;  %v5343_v33 = vrot.slane %v5342_v10, 1 }
 0x12c   : > { %2973 = vmatprep.mubr.bf16.mxu1 %v2461_v63  ;;  %v1238_v26 = vadd.f32 %v1138_v3, %v993_v41  ;;  %v1693_v17 = vrot.slane %v1591_v7, 2  ;;  %v1694_v36 = vrot.slane %v1592_v43, 2  ;;  %v1307_v23 = vadd.f32 %v1275_v19, %v1237_v56  ;;  %v500_v7 = vpop.permute.xlu1 %499  ;;  %v498_v56 = vpop.permute.xlu0 %497 }
 0x12d   : > { %v1453_v34 = vsel %vm873_vm1, %v1450_v53, %v5343_v33  ;;  %v1906_v30 = vmul.f32 %v3493_v0, %v3944_v42  ;;  %v1907_v16 = vmul.f32 %v3493_v0, %v3947_v49  ;;  %v1908_v40 = vmul.f32 %v3493_v0, %v3912_v44 }
 0x12e   : > { %v1308_v48 = vadd.f32 %v1276_v5, %v1238_v26  ;;  %v1695_v2 = vsel %vm1118_vm2, %v1693_v17, %v1694_v36  ;;  %v1697_v3 = vsel %vm1118_vm2, %v1694_v36, %v1696_v46  ;;  %v2150_v53 = vmul.f32 %v3798_v52, %v3944_v42  ;;  %v3108_v17 = vld [vmem:[%s3292_s11 + $0xbc] ss:$0 sps:$4 sm:$0x11]  }
 0x12f   : > { %v1552_v19 = vadd.f32 %v1451_v60, %v1307_v23  ;;  %v2008_v63 = vrot.slane %v1906_v30, 1  ;;  %v2009_v31 = vrot.slane %v1907_v16, 1  ;;  %v2011_v41 = vrot.slane %v1908_v40, 1  ;;  %v3109_v40 = vld [vmem:[%s3292_s11 + $0xb4] sm:$0xff]  }
 0x130   : > { %v1553_v5 = vadd.f32 %v1453_v34, %v1308_v48  ;;  %v2151_v43 = vmul.f32 %v3798_v52, %v3947_v49  ;;  %v2152_v46 = vmul.f32 %v3798_v52, %v3912_v44  ;;  %v2252_v54 = vrot.slane %v2150_v53, 2 }
 0x131   : > { %v1796_v26 = vadd.f32 %v1695_v2, %v1552_v19  ;;  %v2010_v33 = vsel %vm873_vm1, %v2008_v63, %v2009_v31  ;;  %v636_v60 = vsel %vm509_vm0, %v3108_v17, %v500_v7  ;;  %v2012_v34 = vsel %vm873_vm1, %v2009_v31, %v2011_v41 }
 0x132   : > { %v1797_v10 = vadd.f32 %v1697_v3, %v1553_v5  ;;  %v2253_v36 = vrot.slane %v2151_v43, 2  ;;  %v2255_v23 = vrot.slane %v2152_v46, 2  ;;  %v4364_v48 = vunpack.c.l.bf16 %v636_v60 }
 0x133   : > { %v1866_v30 = vadd.f32 %v1834_v39, %v1796_v26  ;;  %v632_v52 = vsel %vm509_vm0, %v3109_v40, %v498_v56  ;;  %v715_v44 = vmul.f32 %v5292_v12, %v3727_v13  ;;  %v716_v26 = vmul.f32 %v5292_v12, %v5304_v35 }
 0x134   : > { %5344 = vst [vmem:[#allocation32_spill] sm:$0xff] %v4364_v48  ;;  %v1867_v16 = vadd.f32 %v1835_v1, %v1797_v10  ;;  %v2254_v2 = vsel %vm1118_vm2, %v2252_v54, %v2253_v36  ;;  %v2256_v3 = vsel %vm1118_vm2, %v2253_v36, %v2255_v23  ;;  %v4374_v53 = vmul.f32 %v3473_v57, %v4364_v48 }
 0x135   : > { %v4378_v7 = vmul.f32 %v3477_v59, %v4364_v48  ;;  %v2111_v39 = vadd.f32 %v2010_v33, %v1866_v30  ;;  %v4382_v19 = vmul.f32 %v3479_v61, %v4364_v48  ;;  %v4386_v5 = vmul.f32 %v3481_v62, %v4364_v48 }
 0x136   : > { %v2112_v1 = vadd.f32 %v2012_v34, %v1867_v16  ;;  %v4390_v41 = vunpack.c.l.bf16 %v632_v52  ;;  %v4392_v43 = vunpack.c.h.bf16 %v632_v52  ;;  %v810_v10 = vmul.f32 %v3473_v57, %v3727_v13 }
 0x137   : > { %5345 = vst [vmem:[#allocation40_spill] sm:$0xff] %v4382_v19  ;;  %5346 = vst [vmem:[#allocation41_spill] sm:$0xff] %v4386_v5  ;;  %v2355_v46 = vadd.f32 %v2254_v2, %v2111_v39  ;;  %v811_v33 = vmul.f32 %v3473_v57, %v5304_v35  ;;  %v1055_v17 = vmul.f32 %v3477_v59, %v3727_v13  ;;  %v1701_v48 = vrot.slane %v3942_v58, 2 }
 0x138   : > { %v2356_v54 = vadd.f32 %v2256_v3, %v2112_v1  ;;  %v1056_v60 = vmul.f32 %v3477_v59, %v5304_v35  ;;  %v1291_v23 = vmul.f32 %v3489_v20, %v3854_v28  ;;  %v1292_v30 = vmul.f32 %v3489_v20, %v3856_v8  ;;  %v5347_v1 = vld [vmem:[#allocation34_spill] sm:$0xff] }
 0x139   : > { %v2393_v34 = vadd.f32 %v3832_v21, %v2355_v46  ;;  %v929_v16 = vrot.slane %v810_v10, 1  ;;  %v930_v40 = vrot.slane %v811_v33, 1  ;;  %v1174_v52 = vrot.slane %v1055_v17, 2  ;;  %v5349_v10 = vld [vmem:[#allocation35_spill] sm:$0xff] }
 0x13a   : > { %v2394_v36 = vadd.f32 %v3832_v21, %v2356_v54  ;;  %v1175_v2 = vrot.slane %v1056_v60, 2  ;;  %v1371_v13 = vmul.f32 %v3479_v61, %v3854_v28  ;;  %v1372_v35 = vmul.f32 %v3479_v61, %v3856_v8 }
 0x13b   : > { %v2425_v3 = vmax.f32 %v2393_v34, 0.0  ;;  %v931_v21 = vsel %vm873_vm1, %v929_v16, %v930_v40  ;;  %v5348_v46 = vrot.slane %v5347_v1, 1  ;;  %v5350_v33 = vrot.slane %v5349_v10, 2 }
 0x13c   : > { %v2426_v39 = vmax.f32 %v2394_v36, 0.0  ;;  %v1176_v56 = vsel %vm1118_vm2, %v1174_v52, %v1175_v2  ;;  %v1008_v34 = vadd.f32 %v931_v21, %v715_v44  ;;  %v1489_v31 = vrot.slane %v1371_v13, 1 }
 0x13d   : > { %v933_v54 = vsel %vm873_vm1, %v930_v40, %v5348_v46  ;;  %v1178_v17 = vsel %vm1118_vm2, %v1175_v2, %v5350_v33  ;;  %v1490_v63 = vrot.slane %v1372_v35, 1  ;;  %v1615_v19 = vmul.f32 %v3481_v62, %v3854_v28 }
 0x13e   : > { %v2454_v60 = vpack.c.bf16 %v2426_v39, %v2425_v3  ;;  %v1009_v36 = vadd.f32 %v933_v54, %v716_v26  ;;  %v1616_v16 = vmul.f32 %v3481_v62, %v3856_v8  ;;  %v1736_v1 = vrot.slane %v3850_v50, 2 }
 0x13f   : > { %v1253_v40 = vadd.f32 %v1176_v56, %v1008_v34  ;;  %v1850_v46 = vmul.f32 %v3491_v29, %v4028_v15  ;;  %v1851_v44 = vmul.f32 %v3491_v29, %v4030_v45  ;;  %v1491_v26 = vsel %vm873_vm1, %v1489_v31, %v1490_v63 }
 0x140   : > { %2958 = vmatmul.mubr.bf16.gmra.mrb[4].mxu0 %v2454_v60  ;;  %v1254_v52 = vadd.f32 %v1178_v17, %v1009_v36  ;;  %v5351_v2 = vrot.slane %v3846_v9, 1  ;;  %v1733_v39 = vrot.slane %v1615_v19, 2  ;;  %v1734_v13 = vrot.slane %v1616_v16, 2  ;;  %v4447_v9 = vld [vmem:[%s5158_s1 + $0x8] ss:$0 sm:$0xff] }
 0x141   : > { %v1323_v35 = vadd.f32 %v1291_v23, %v1253_v40  ;;  %v1930_v50 = vmul.f32 %v3493_v0, %v4028_v15  ;;  %v1931_v56 = vmul.f32 %v3493_v0, %v4030_v45  ;;  %v1932_v31 = vmul.f32 %v3493_v0, %v4004_v47 }
 0x142   : > { %v1493_v3 = vsel %vm873_vm1, %v1490_v63, %v5351_v2  ;;  %v1324_v21 = vadd.f32 %v1292_v30, %v1254_v52  ;;  %v1735_v54 = vsel %vm1118_vm2, %v1733_v39, %v1734_v13  ;;  %v1737_v10 = vsel %vm1118_vm2, %v1734_v13, %v1736_v1  ;;  %v504_v63 = vpop.permute.xlu1 %503  ;;  %v502_v1 = vpop.permute.xlu0 %501  ;;  %v3111_v39 = vld [vmem:[%s3292_s11 + $0xc8] ss:$0 sps:$4 sm:$0x11]  }
 0x143   : > { %v2174_v19 = vmul.f32 %v4447_v9, %v4028_v15  ;;  %v1568_v23 = vadd.f32 %v1491_v26, %v1323_v35  ;;  %v2048_v33 = vrot.slane %v1930_v50, 1  ;;  %v2049_v17 = vrot.slane %v1931_v56, 1 }
 0x144   : > { %v1569_v30 = vadd.f32 %v1493_v3, %v1324_v21  ;;  %v2051_v60 = vrot.slane %v1932_v31, 1  ;;  %v2175_v34 = vmul.f32 %v4447_v9, %v4030_v45  ;;  %v2176_v36 = vmul.f32 %v4447_v9, %v4004_v47  ;;  %v3112_v31 = vld [vmem:[%s3292_s11 + $0xc0] sm:$0xff]  }
 0x145   : > { %v2292_v16 = vrot.slane %v2174_v19, 2  ;;  %v1812_v40 = vadd.f32 %v1735_v54, %v1568_v23  ;;  %v2050_v2 = vsel %vm873_vm1, %v2048_v33, %v2049_v17  ;;  %v644_v26 = vsel %vm509_vm0, %v3111_v39, %v504_v63 }
 0x146   : > { %v1813_v52 = vadd.f32 %v1737_v10, %v1569_v30  ;;  %v2052_v3 = vsel %vm873_vm1, %v2049_v17, %v2051_v60  ;;  %v2293_v13 = vrot.slane %v2175_v34, 2  ;;  %v2295_v35 = vrot.slane %v2176_v36, 2 }
 0x147   : > { %v1333_v21 = vunpack.c.l.bf16 %v644_v26  ;;  %v1882_v50 = vadd.f32 %v1850_v46, %v1812_v40  ;;  %v640_v5 = vsel %vm509_vm0, %v3112_v31, %v502_v1  ;;  %v701_v47 = vmul.f32 %v5292_v12, %v5317_v51 }
 0x148   : > { %v1883_v56 = vadd.f32 %v1851_v44, %v1813_v52  ;;  %v2294_v54 = vsel %vm1118_vm2, %v2292_v16, %v2293_v13  ;;  %v2296_v10 = vsel %vm1118_vm2, %v2293_v13, %v2295_v35  ;;  %v4479_v60 = vunpack.c.l.bf16 %v640_v5 }
 0x149   : > { %v4466_v19 = vmul.f32 %v3479_v61, %v1333_v21  ;;  %v4469_v63 = vmul.f32 %v3481_v62, %v1333_v21  ;;  %v2127_v23 = vadd.f32 %v2050_v2, %v1882_v50  ;;  %v4472_v46 = vmul.f32 %v3493_v0, %v1333_v21 }
 0x14a   : > { %v2128_v30 = vadd.f32 %v2052_v3, %v1883_v56  ;;  %v4475_v44 = vmul.f32 %v4447_v9, %v1333_v21  ;;  %v4481_v34 = vunpack.c.h.bf16 %v640_v5  ;;  %v702_v52 = vmul.f32 %v5292_v12, %v5318_v11  ;;  %v4496_v5 = vld [vmem:[%s5159_s2] ss:$0 sm:$0xff] }
 0x14b   : > { %5352 = vst [vmem:[#allocation31_spill] sm:$0xff] %v4472_v46  ;;  %v2371_v36 = vadd.f32 %v2294_v54, %v2127_v23  ;;  %v789_v2 = vmul.f32 %v3473_v57, %v5317_v51  ;;  %v790_v39 = vmul.f32 %v3473_v57, %v5318_v11  ;;  %v1034_v26 = vmul.f32 %v3477_v59, %v5317_v51 }
 0x14c   : > { %5353 = vst [vmem:[#allocation39_spill] sm:$0xff] %v4475_v44  ;;  %v2372_v16 = vadd.f32 %v2296_v10, %v2128_v30  ;;  %v1035_v35 = vmul.f32 %v3477_v59, %v5318_v11  ;;  %v1277_v21 = vmul.f32 %v3489_v20, %v3944_v42  ;;  %v1278_v51 = vmul.f32 %v3489_v20, %v3947_v49 }
 0x14d   : > { %v2409_v3 = vadd.f32 %v4496_v5, %v2371_v36  ;;  %v894_v50 = vrot.slane %v789_v2, 1  ;;  %v895_v56 = vrot.slane %v790_v39, 1  ;;  %v1139_v31 = vrot.slane %v1034_v26, 2 }
 0x14e   : > { %v2410_v13 = vadd.f32 %v4496_v5, %v2372_v16  ;;  %v1140_v23 = vrot.slane %v1035_v35, 2  ;;  %v1350_v30 = vmul.f32 %v3479_v61, %v3944_v42  ;;  %v5354_v16 = vld [vmem:[#allocation42_spill] sm:$0xff]  ;;  %v1351_v2 = vmul.f32 %v3479_v61, %v3947_v49  ;;  %v5356_v35 = vld [vmem:[#allocation43_spill] sm:$0xff] }
 0x14f   : > { %v2441_v54 = vmax.f32 %v2409_v3, 0.0  ;;  %v896_v36 = vsel %vm873_vm1, %v894_v50, %v895_v56  ;;  %v5355_v40 = vrot.slane %v5354_v16, 1  ;;  %v1594_v39 = vmul.f32 %v3481_v62, %v3944_v42 }
 0x150   : > { %v2442_v10 = vmax.f32 %v2410_v13, 0.0  ;;  %v994_v1 = vadd.f32 %v896_v36, %v701_v47  ;;  %v1141_v13 = vsel %vm1118_vm2, %v1139_v31, %v1140_v23  ;;  %v5357_v17 = vrot.slane %v5356_v35, 2 }
 0x151   : > { %v898_v11 = vsel %vm873_vm1, %v895_v56, %v5355_v40  ;;  %v1454_v50 = vrot.slane %v1350_v30, 1  ;;  %v1455_v44 = vrot.slane %v1351_v2, 1  ;;  %v1595_v40 = vmul.f32 %v3481_v62, %v3947_v49 }
 0x152   : > { %v2462_v26 = vpack.c.bf16 %v2442_v10, %v2441_v54  ;;  %v995_v3 = vadd.f32 %v898_v11, %v702_v52  ;;  %v1143_v33 = vsel %vm1118_vm2, %v1140_v23, %v5357_v17  ;;  %v1239_v56 = vadd.f32 %v1141_v13, %v994_v1 }
 0x153   : > { %v1698_v46 = vrot.slane %v1594_v39, 2  ;;  %v1456_v47 = vsel %vm873_vm1, %v1454_v50, %v1455_v44  ;;  %v5358_v52 = vrot.slane %v3938_v38, 1  ;;  %v1699_v54 = vrot.slane %v1595_v40, 2 }
 0x154   : > { %2974 = vmatmul.mubr.bf16.gmra.mrb[4].mxu1 %v2462_v26  ;;  %v1240_v16 = vadd.f32 %v1143_v33, %v995_v3  ;;  %v1836_v17 = vmul.f32 %v3491_v29, %v4120_v24  ;;  %v1309_v10 = vadd.f32 %v1277_v21, %v1239_v56  ;;  %v1837_v30 = vmul.f32 %v3491_v29, %v4122_v27 }
 0x155   : > { %v1458_v31 = vsel %vm873_vm1, %v1455_v44, %v5358_v52  ;;  %v1909_v33 = vmul.f32 %v3493_v0, %v4120_v24  ;;  %v1700_v58 = vsel %vm1118_vm2, %v1698_v46, %v1699_v54  ;;  %v1702_v1 = vsel %vm1118_vm2, %v1699_v54, %v1701_v48 }
 0x156   : > { %v1310_v23 = vadd.f32 %v1278_v51, %v1240_v16  ;;  %v1910_v38 = vmul.f32 %v3493_v0, %v4122_v27  ;;  %v1911_v44 = vmul.f32 %v3493_v0, %v4094_v14  ;;  %v1554_v36 = vadd.f32 %v1456_v47, %v1309_v10 }
 0x157   : > { %v2013_v21 = vrot.slane %v1909_v33, 1  ;;  %v2153_v51 = vmul.f32 %v4447_v9, %v4120_v24  ;;  %v2154_v26 = vmul.f32 %v4447_v9, %v4122_v27  ;;  %v2155_v48 = vmul.f32 %v4447_v9, %v4094_v14 }
 0x158   : > { %v1555_v11 = vadd.f32 %v1458_v31, %v1310_v23  ;;  %v2014_v2 = vrot.slane %v1910_v38, 1  ;;  %v2016_v39 = vrot.slane %v1911_v44, 1  ;;  %v1798_v46 = vadd.f32 %v1700_v58, %v1554_v36 }
 0x159   : > { %v2257_v13 = vrot.slane %v2153_v51, 2  ;;  %v717_v35 = vmul.f32 %v5292_v12, %v3854_v28  ;;  %v2258_v56 = vrot.slane %v2154_v26, 2  ;;  %v2260_v16 = vrot.slane %v2155_v48, 2 }
 0x15a   : > { %v1799_v3 = vadd.f32 %v1702_v1, %v1555_v11  ;;  %v2015_v50 = vsel %vm873_vm1, %v2013_v21, %v2014_v2  ;;  %v2017_v40 = vsel %vm873_vm1, %v2014_v2, %v2016_v39  ;;  %v1868_v47 = vadd.f32 %v1836_v17, %v1798_v46 }
 0x15b   : > { %v718_v31 = vmul.f32 %v5292_v12, %v3856_v8  ;;  %v813_v14 = vmul.f32 %v3473_v57, %v3854_v28  ;;  %v2259_v54 = vsel %vm1118_vm2, %v2257_v13, %v2258_v56  ;;  %v2261_v10 = vsel %vm1118_vm2, %v2258_v56, %v2260_v16 }
 0x15c   : > { %v1869_v52 = vadd.f32 %v1837_v30, %v1799_v3  ;;  %v814_v23 = vmul.f32 %v3473_v57, %v3856_v8  ;;  %v1058_v33 = vmul.f32 %v3477_v59, %v3854_v28  ;;  %v2113_v58 = vadd.f32 %v2015_v50, %v1868_v47 }
 0x15d   : > { %v934_v17 = vrot.slane %v813_v14, 1  ;;  %v1059_v30 = vmul.f32 %v3477_v59, %v3856_v8  ;;  %v1293_v36 = vmul.f32 %v3489_v20, %v4028_v15  ;;  %v1294_v11 = vmul.f32 %v3489_v20, %v4030_v45 }
 0x15e   : > { %v2114_v1 = vadd.f32 %v2017_v40, %v1869_v52  ;;  %v935_v38 = vrot.slane %v814_v23, 1  ;;  %v1179_v44 = vrot.slane %v1058_v33, 2  ;;  %v2357_v21 = vadd.f32 %v2259_v54, %v2113_v58  ;;  %v5361_v58 = vld [vmem:[#allocation22_spill] sm:$0xff] }
 0x15f   : > { %v1180_v2 = vrot.slane %v1059_v30, 2  ;;  %v1374_v28 = vmul.f32 %v3479_v61, %v4028_v15  ;;  %v5359_v26 = vrot.slane %v3838_v32, 1  ;;  %v1375_v48 = vmul.f32 %v3479_v61, %v4030_v45 }
 0x160   : > { %v2358_v51 = vadd.f32 %v2261_v10, %v2114_v1  ;;  %v936_v39 = vsel %vm873_vm1, %v934_v17, %v935_v38  ;;  %v1618_v46 = vmul.f32 %v3481_v62, %v4028_v15  ;;  %v2395_v3 = vadd.f32 %v4496_v5, %v2357_v21 }
 0x161   : > { %v938_v8 = vsel %vm873_vm1, %v935_v38, %v5359_v26  ;;  %v1010_v50 = vadd.f32 %v936_v39, %v717_v35  ;;  %v1181_v56 = vsel %vm1118_vm2, %v1179_v44, %v1180_v2  ;;  %v5360_v16 = vrot.slane %v3842_v22, 2  ;;  %v5363_v44 = vld [vmem:[#allocation5_spill] sm:$0xff] }
 0x162   : > { %v2396_v13 = vadd.f32 %v4496_v5, %v2358_v51  ;;  %v1011_v40 = vadd.f32 %v938_v8, %v718_v31  ;;  %v1494_v47 = vrot.slane %v1374_v28, 1  ;;  %v1495_v52 = vrot.slane %v1375_v48, 1  ;;  %v508_v48 = vpop.permute.xlu1 %507 }
 0x163   : > { %v1183_v32 = vsel %vm1118_vm2, %v1180_v2, %v5360_v16  ;;  %v2427_v14 = vmax.f32 %v2395_v3, 0.0  ;;  %v1255_v10 = vadd.f32 %v1181_v56, %v1010_v50  ;;  %v5362_v1 = vrot.slane %v5361_v58, 1 }
 0x164   : > { %v2428_v54 = vmax.f32 %v2396_v13, 0.0  ;;  %v1256_v23 = vadd.f32 %v1183_v32, %v1011_v40  ;;  %v1496_v33 = vsel %vm873_vm1, %v1494_v47, %v1495_v52  ;;  %v1619_v35 = vmul.f32 %v3481_v62, %v4030_v45 }
 0x165   : > { %v1498_v17 = vsel %vm873_vm1, %v1495_v52, %v5362_v1  ;;  %v1738_v31 = vrot.slane %v1618_v46, 2  ;;  %v1325_v22 = vadd.f32 %v1293_v36, %v1255_v10  ;;  %v1741_v21 = vrot.slane %v5363_v44, 2 }
 0x166   : > { %v2455_v30 = vpack.c.bf16 %v2428_v54, %v2427_v14  ;;  %v1326_v38 = vadd.f32 %v1294_v11, %v1256_v23  ;;  %v1739_v51 = vrot.slane %v1619_v35, 2  ;;  %v1852_v2 = vmul.f32 %v3491_v29, %v4210_v55  ;;  %v3114_v54 = vld [vmem:[%s3292_s11 + $0xd4] ss:$0 sps:$4 sm:$0x11]  }
 0x167   : > { %v1853_v28 = vmul.f32 %v3491_v29, %v4212_v37  ;;  %v1933_v39 = vmul.f32 %v3493_v0, %v4210_v55  ;;  %v1570_v26 = vadd.f32 %v1496_v33, %v1325_v22  ;;  %v1934_v36 = vmul.f32 %v3493_v0, %v4212_v37 }
 0x168   : > { %2961 = vmatprep.mubr.bf16.mxu0 %v2455_v30  ;;  %v1571_v8 = vadd.f32 %v1498_v17, %v1326_v38  ;;  %v1935_v11 = vmul.f32 %v3493_v0, %v4184_v6  ;;  %v1740_v46 = vsel %vm1118_vm2, %v1738_v31, %v1739_v51  ;;  %v1742_v3 = vsel %vm1118_vm2, %v1739_v51, %v1741_v21 }
 0x169   : > { %v2053_v13 = vrot.slane %v1933_v39, 1  ;;  %v2177_v50 = vmul.f32 %v4447_v9, %v4210_v55  ;;  %v1814_v40 = vadd.f32 %v1740_v46, %v1570_v26  ;;  %v2054_v16 = vrot.slane %v1934_v36, 1 }
 0x16a   : > { %v1815_v56 = vadd.f32 %v1742_v3, %v1571_v8  ;;  %v2056_v32 = vrot.slane %v1935_v11, 1  ;;  %v2178_v47 = vmul.f32 %v4447_v9, %v4212_v37  ;;  %v2179_v52 = vmul.f32 %v4447_v9, %v4184_v6 }
 0x16b   : > { %v2297_v14 = vrot.slane %v2177_v50, 2  ;;  %v652_v10 = vsel %vm509_vm0, %v3114_v54, %v508_v48  ;;  %v1884_v23 = vadd.f32 %v1852_v2, %v1814_v40  ;;  %v2055_v58 = vsel %vm873_vm1, %v2053_v13, %v2054_v16  ;;  %v5373_v48 = vld [vmem:[#allocation18_spill] sm:$0xff] }
 0x16c   : > { %v1885_v33 = vadd.f32 %v1853_v28, %v1815_v56  ;;  %v2057_v1 = vsel %vm873_vm1, %v2054_v16, %v2056_v32  ;;  %v2298_v17 = vrot.slane %v2178_v47, 2  ;;  %v2300_v35 = vrot.slane %v2179_v52, 2 }
 0x16d   : > { %v1892_v31 = vunpack.c.l.bf16 %v652_v10  ;;  %v723_v30 = vmul.f32 %v5292_v12, %v4390_v41  ;;  %v2129_v22 = vadd.f32 %v2055_v58, %v1884_v23  ;;  %v724_v6 = vmul.f32 %v5292_v12, %v4392_v43  ;;  %v506_v58 = vpop.permute.xlu0 %505 }
 0x16e   : > { %v2130_v38 = vadd.f32 %v2057_v1, %v1885_v33  ;;  %v822_v44 = vmul.f32 %v3473_v57, %v4390_v41  ;;  %v2299_v21 = vsel %vm1118_vm2, %v2297_v14, %v2298_v17  ;;  %v2301_v51 = vsel %vm1118_vm2, %v2298_v17, %v2300_v35 }
 0x16f   : > { %v4619_v2 = vmul.f32 %v3493_v0, %v1892_v31  ;;  %v4622_v28 = vmul.f32 %v4447_v9, %v1892_v31  ;;  %v2373_v39 = vadd.f32 %v2299_v21, %v2129_v22  ;;  %v823_v8 = vmul.f32 %v3473_v57, %v4392_v43 }
 0x170   : > { %v2374_v26 = vadd.f32 %v2301_v51, %v2130_v38  ;;  %v949_v36 = vrot.slane %v822_v44, 1  ;;  %v1067_v46 = vmul.f32 %v3477_v59, %v4390_v41  ;;  %v1068_v3 = vmul.f32 %v3477_v59, %v4392_v43 }
 0x171   : > { %v2071_v11 = vrot.slane %v4619_v2, 1  ;;  %v2411_v13 = vadd.f32 %v4496_v5, %v2373_v39  ;;  %v950_v40 = vrot.slane %v823_v8, 1  ;;  %v1299_v56 = vmul.f32 %v3489_v20, %v4479_v60 }
 0x172   : > { %v2412_v50 = vadd.f32 %v4496_v5, %v2374_v26  ;;  %v1194_v16 = vrot.slane %v1067_v46, 2  ;;  %v1195_v32 = vrot.slane %v1068_v3, 2  ;;  %v1300_v47 = vmul.f32 %v3489_v20, %v4481_v34 }
 0x173   : > { %v1383_v52 = vmul.f32 %v3479_v61, %v4479_v60  ;;  %v2443_v14 = vmax.f32 %v2411_v13, 0.0  ;;  %v951_v10 = vsel %vm873_vm1, %v949_v36, %v950_v40  ;;  %v5364_v23 = vrot.slane %v4374_v53, 1 }
 0x174   : > { %v2444_v54 = vmax.f32 %v2412_v50, 0.0  ;;  %v1016_v1 = vadd.f32 %v951_v10, %v723_v30  ;;  %v1196_v35 = vsel %vm1118_vm2, %v1194_v16, %v1195_v32  ;;  %v5365_v31 = vrot.slane %v4378_v7, 2 }
 0x175   : > { %v953_v33 = vsel %vm873_vm1, %v950_v40, %v5364_v23  ;;  %v1384_v44 = vmul.f32 %v3479_v61, %v4481_v34  ;;  %v1509_v21 = vrot.slane %v1383_v52, 1  ;;  %v1627_v51 = vmul.f32 %v3481_v62, %v4479_v60 }
 0x176   : > { %v1017_v17 = vadd.f32 %v953_v33, %v724_v6  ;;  %v1198_v22 = vsel %vm1118_vm2, %v1195_v32, %v5365_v31  ;;  %v2463_v38 = vpack.c.bf16 %v2444_v54, %v2443_v14  ;;  %v1261_v53 = vadd.f32 %v1196_v35, %v1016_v1  ;;  %v3115_v6 = vld [vmem:[%s3292_s11 + $0xcc] sm:$0xff]   ;;  %s3199_s11 = smov [#allocation2]  }
 0x177   : > { %v1628_v30 = vmul.f32 %v3481_v62, %v4481_v34  ;;  %v648_v26 = vsel %vm509_vm0, %v3115_v6, %v506_v58  ;;  %v1510_v7 = vrot.slane %v1384_v44, 1  ;;  %v1753_v8 = vrot.slane %v1627_v51, 2  ;;  %s3122_s10 = sshll.u32 %s3199_s11, 4  ;;  %s3123_s10 = int_to_ptr.vmem [resolvable:$false] %s3122_s10 }
 0x178   : > { %v1262_v39 = vadd.f32 %v1198_v22, %v1017_v17  ;;  %2977 = vmatprep.mubr.bf16.mxu1 %v2463_v38  ;;  %v1822_v36 = vunpack.c.l.bf16 %v648_v26  ;;  %v1823_v46 = vunpack.c.h.bf16 %v648_v26  ;;  %v1331_v3 = vadd.f32 %v1299_v56, %v1261_v53  ;;  %s3124_s14 = scalar_lea.vmem %s3123_s10, 8192  ;;  %p3125_p1 = scmp.lt.s32.totalorder %s5101_s27, %s3123_s10 }
 0x179   : > { %v1754_v50 = vrot.slane %v1628_v30, 2  ;;  %v703_v40 = vmul.f32 %v5292_v12, %v3944_v42  ;;  %v1511_v16 = vsel %vm873_vm1, %v1509_v21, %v1510_v7  ;;  %v5366_v32 = vrot.slane %v4466_v19, 1  ;;  %p3126_p2 = scmp.lt.s32.totalorder %s3124_s14, %s3118_s9 }
 0x17a   : > { %v1332_v13 = vadd.f32 %v1300_v47, %v1262_v39  ;;  %v1858_v14 = vmul.f32 %v3491_v29, %v1822_v36  ;;  %v1859_v54 = vmul.f32 %v3491_v29, %v1823_v46  ;;  %v1576_v10 = vadd.f32 %v1511_v16, %v1331_v3 }
 0x17b   : > { %v1513_v52 = vsel %vm873_vm1, %v1510_v7, %v5366_v32  ;;  %v1755_v33 = vsel %vm1118_vm2, %v1753_v8, %v1754_v50  ;;  %v5367_v56 = vrot.slane %v4469_v63, 2  ;;  %v4669_v58 = vmul.f32 %v3493_v0, %v1822_v36  ;;  %v5368_v32 = vld [vmem:[#allocation19_spill] sm:$0xff]  ;;  %p3127_p3 = por %p3126_p2, %p3125_p1 }
 0x17c   : > { %v1577_v23 = vadd.f32 %v1513_v52, %v1332_v13  ;;  %v4672_v1 = vmul.f32 %v3493_v0, %v1823_v46  ;;  %v4675_v19 = vmul.f32 %v4447_v9, %v1822_v36  ;;  %v4678_v17 = vmul.f32 %v4447_v9, %v1823_v46 }
 0x17d   : > { %v1757_v47 = vsel %vm1118_vm2, %v1754_v50, %v5367_v56  ;;  %v1820_v35 = vadd.f32 %v1755_v33, %v1576_v10  ;;  %v704_v22 = vmul.f32 %v5292_v12, %v3947_v49  ;;  %v792_v63 = vmul.f32 %v3473_v57, %v3944_v42  ;;  %p3128_p5 = pnand %p3127_p3, %p3121_p0 }
 0x17e   : > { %v1821_v31 = vadd.f32 %v1757_v47, %v1577_v23  ;;  %v2068_v38 = vrot.slane %v4669_v58, 1  ;;  %v2069_v44 = vrot.slane %v4672_v1, 1  ;;  %v793_v30 = vmul.f32 %v3473_v57, %v3947_v49 }
 0x17f   : > { %v4688_v53 = vadd.f32 %v1858_v14, %v1820_v35  ;;  %v899_v6 = vrot.slane %v792_v63, 1  ;;  %v1037_v26 = vmul.f32 %v3477_v59, %v3944_v42  ;;  %v1038_v7 = vmul.f32 %v3477_v59, %v3947_v49  ;;  %v5371_v63 = vld [vmem:[#allocation47_spill] sm:$0xff] }
 0x180   : > { %v4690_v39 = vadd.f32 %v1859_v54, %v1821_v31  ;;  %v1279_v8 = vmul.f32 %v3489_v20, %v4120_v24  ;;  %v1280_v36 = vmul.f32 %v3489_v20, %v4122_v27  ;;  %v900_v46 = vrot.slane %v793_v30, 1  ;;  %v5369_v54 = vld [vmem:[#allocation46_spill] sm:$0xff] }
 0x181   : > { %v1353_v3 = vmul.f32 %v3479_v61, %v4120_v24  ;;  %v1354_v13 = vmul.f32 %v3479_v61, %v4122_v27  ;;  %v1597_v50 = vmul.f32 %v3481_v62, %v4120_v24  ;;  %v1144_v42 = vrot.slane %v1037_v26, 2 }
 0x182   : > { %v1145_v16 = vrot.slane %v1038_v7, 2  ;;  %v1598_v49 = vmul.f32 %v3481_v62, %v4122_v27  ;;  %v1706_v52 = vrot.slane %v5368_v32, 2  ;;  %v901_v14 = vsel %vm873_vm1, %v899_v6, %v900_v46 }
 0x183   : > { %v5370_v10 = vrot.slane %v5369_v54, 1  ;;  %v1459_v33 = vrot.slane %v1353_v3, 1  ;;  %v1460_v56 = vrot.slane %v1354_v13, 1  ;;  %v996_v47 = vadd.f32 %v901_v14, %v703_v40 }
 0x184   : > { %v1146_v31 = vsel %vm1118_vm2, %v1144_v42, %v1145_v16  ;;  %v5372_v30 = vrot.slane %v5371_v63, 2  ;;  %v5374_v32 = vrot.slane %v5373_v48, 1  ;;  %v1703_v21 = vrot.slane %v1597_v50, 2 }
 0x185   : > { %v903_v23 = vsel %vm873_vm1, %v900_v46, %v5370_v10  ;;  %v1461_v7 = vsel %vm873_vm1, %v1459_v33, %v1460_v56  ;;  %v1704_v54 = vrot.slane %v1598_v49, 2  ;;  %v1241_v51 = vadd.f32 %v1146_v31, %v996_v47 }
 0x186   : > { %v997_v35 = vadd.f32 %v903_v23, %v704_v22  ;;  %v1148_v26 = vsel %vm1118_vm2, %v1145_v16, %v5372_v30  ;;  %v1463_v6 = vsel %vm873_vm1, %v1460_v56, %v5374_v32  ;;  %v1838_v40 = vmul.f32 %v3491_v29, %v4300_v25 }
 0x187   : > { %v1839_v22 = vmul.f32 %v3491_v29, %v4302_v18  ;;  %v1705_v3 = vsel %vm1118_vm2, %v1703_v21, %v1704_v54  ;;  %v1707_v13 = vsel %vm1118_vm2, %v1704_v54, %v1706_v52  ;;  %v1912_v42 = vmul.f32 %v3493_v0, %v4300_v25 }
 0x188   : > { %v1242_v46 = vadd.f32 %v1148_v26, %v997_v35  ;;  %v1913_v48 = vmul.f32 %v3493_v0, %v4302_v18  ;;  %v1311_v50 = vadd.f32 %v1279_v8, %v1241_v51  ;;  %v1914_v49 = vmul.f32 %v3493_v0, %v4274_v4 }
 0x189   : > { %v2156_v14 = vmul.f32 %v4447_v9, %v4300_v25  ;;  %v2018_v10 = vrot.slane %v1912_v42, 1  ;;  %v2157_v21 = vmul.f32 %v4447_v9, %v4302_v18  ;;  %v2158_v52 = vmul.f32 %v4447_v9, %v4274_v4 }
 0x18a   : > { %v1312_v16 = vadd.f32 %v1280_v36, %v1242_v46  ;;  %v2019_v23 = vrot.slane %v1913_v48, 1  ;;  %v1556_v33 = vadd.f32 %v1461_v7, %v1311_v50  ;;  %v2021_v47 = vrot.slane %v1914_v49, 1 }
 0x18b   : > { %v2262_v35 = vrot.slane %v2156_v14, 2  ;;  %v2263_v8 = vrot.slane %v2157_v21, 2  ;;  %v2265_v36 = vrot.slane %v2158_v52, 2  ;;  %v719_v31 = vmul.f32 %v5292_v12, %v4028_v15 }
 0x18c   : > { %v1557_v56 = vadd.f32 %v1463_v6, %v1312_v16  ;;  %v2020_v51 = vsel %vm873_vm1, %v2018_v10, %v2019_v23  ;;  %v1800_v63 = vadd.f32 %v1705_v3, %v1556_v33  ;;  %v2022_v26 = vsel %vm873_vm1, %v2019_v23, %v2021_v47 }
 0x18d   : > { %v720_v32 = vmul.f32 %v5292_v12, %v4030_v45  ;;  %v2264_v4 = vsel %vm1118_vm2, %v2262_v35, %v2263_v8  ;;  %v2266_v7 = vsel %vm1118_vm2, %v2263_v8, %v2265_v36  ;;  %v816_v6 = vmul.f32 %v3473_v57, %v4028_v15  ;;  %v5377_v36 = vld [vmem:[#allocation28_spill] sm:$0xff] }
 0x18e   : > { %v1801_v30 = vadd.f32 %v1707_v13, %v1557_v56  ;;  %v817_v54 = vmul.f32 %v3473_v57, %v4030_v45  ;;  %v1870_v46 = vadd.f32 %v1838_v40, %v1800_v63  ;;  %v1061_v3 = vmul.f32 %v3477_v59, %v4028_v15 }
 0x18f   : > { %v1062_v13 = vmul.f32 %v3477_v59, %v4030_v45  ;;  %v939_v48 = vrot.slane %v816_v6, 1  ;;  %v1295_v16 = vmul.f32 %v3489_v20, %v4210_v55  ;;  %v1296_v49 = vmul.f32 %v3489_v20, %v4212_v37 }
 0x190   : > { %v1871_v42 = vadd.f32 %v1839_v22, %v1801_v30  ;;  %v940_v50 = vrot.slane %v817_v54, 1  ;;  %v2115_v14 = vadd.f32 %v2020_v51, %v1870_v46  ;;  %v1184_v23 = vrot.slane %v1061_v3, 2  ;;  %v5375_v22 = vld [vmem:[#allocation27_spill] sm:$0xff] }
 0x191   : > { %v1185_v21 = vrot.slane %v1062_v13, 2  ;;  %v5376_v52 = vrot.slane %v5375_v22, 1  ;;  %v1377_v45 = vmul.f32 %v3479_v61, %v4210_v55  ;;  %v1378_v33 = vmul.f32 %v3479_v61, %v4212_v37  ;;  %v5381_v22 = vld [vmem:[#allocation33_spill] sm:$0xff] }
 0x192   : > { %v2116_v10 = vadd.f32 %v2022_v26, %v1871_v42  ;;  %v941_v40 = vsel %vm873_vm1, %v939_v48, %v940_v50  ;;  %v2359_v56 = vadd.f32 %v2264_v4, %v2115_v14  ;;  %v5378_v63 = vrot.slane %v5377_v36, 2  ;;  %v5379_v4 = vld [vmem:[#allocation38_spill] sm:$0xff] }
 0x193   : > { %v943_v15 = vsel %vm873_vm1, %v940_v50, %v5376_v52  ;;  %v1012_v35 = vadd.f32 %v941_v40, %v719_v31  ;;  %v1186_v51 = vsel %vm1118_vm2, %v1184_v23, %v1185_v21  ;;  %v1499_v26 = vrot.slane %v1377_v45, 1 }
 0x194   : > { %v2360_v47 = vadd.f32 %v2266_v7, %v2116_v10  ;;  %v1013_v8 = vadd.f32 %v943_v15, %v720_v32  ;;  %v1188_v30 = vsel %vm1118_vm2, %v1185_v21, %v5378_v63  ;;  %v1500_v6 = vrot.slane %v1378_v33, 1  ;;  %v5382_v63 = vld [vmem:[#allocation32_spill] sm:$0xff] }
 0x195   : > { %v2397_v54 = vadd.f32 %v4496_v5, %v2359_v56  ;;  %v1257_v42 = vadd.f32 %v1186_v51, %v1012_v35  ;;  %v5380_v7 = vrot.slane %v5379_v4, 1  ;;  %v1621_v32 = vmul.f32 %v3481_v62, %v4210_v55 }
 0x196   : > { %v2398_v46 = vadd.f32 %v4496_v5, %v2360_v47  ;;  %v1258_v3 = vadd.f32 %v1188_v30, %v1013_v8  ;;  %v1501_v13 = vsel %vm873_vm1, %v1499_v26, %v1500_v6  ;;  %v1622_v48 = vmul.f32 %v3481_v62, %v4212_v37 }
 0x197   : > { %v1503_v31 = vsel %vm873_vm1, %v1500_v6, %v5380_v7  ;;  %v2429_v50 = vmax.f32 %v2397_v54, 0.0  ;;  %v1327_v10 = vadd.f32 %v1295_v16, %v1257_v42  ;;  %v1743_v21 = vrot.slane %v1621_v32, 2 }
 0x198   : > { %v2430_v14 = vmax.f32 %v2398_v46, 0.0  ;;  %v1328_v23 = vadd.f32 %v1296_v49, %v1258_v3  ;;  %v1744_v40 = vrot.slane %v1622_v48, 2  ;;  %v1746_v52 = vrot.slane %v5381_v22, 2 }
 0x199   : > { %v1854_v15 = vmul.f32 %v3491_v29, %v4390_v41  ;;  %v1572_v33 = vadd.f32 %v1501_v13, %v1327_v10  ;;  %v1855_v47 = vmul.f32 %v3491_v29, %v4392_v43  ;;  %v1936_v16 = vmul.f32 %v3493_v0, %v4390_v41 }
 0x19a   : > { %v2456_v45 = vpack.c.bf16 %v2430_v14, %v2429_v50  ;;  %v1573_v56 = vadd.f32 %v1503_v31, %v1328_v23  ;;  %v1745_v35 = vsel %vm1118_vm2, %v1743_v21, %v1744_v40  ;;  %v1747_v8 = vsel %vm1118_vm2, %v1744_v40, %v1746_v52 }
 0x19b   : > { %v1937_v49 = vmul.f32 %v3493_v0, %v4392_v43  ;;  %v1816_v51 = vadd.f32 %v1745_v35, %v1572_v33  ;;  %v1938_v30 = vmul.f32 %v3493_v0, %v5382_v63  ;;  %v2180_v26 = vmul.f32 %v4447_v9, %v4390_v41 }
 0x19c   : > { %2962 = vmatmul.mubr.bf16.gmra.mrb[8].mxu0 %v2456_v45  ;;  %v1817_v36 = vadd.f32 %v1747_v8, %v1573_v56  ;;  %v2058_v6 = vrot.slane %v1936_v16, 1  ;;  %v2181_v46 = vmul.f32 %v4447_v9, %v4392_v43  ;;  %v2182_v42 = vmul.f32 %v4447_v9, %v5382_v63 }
 0x19d   : > { %v2059_v54 = vrot.slane %v1937_v49, 1  ;;  %v1886_v3 = vadd.f32 %v1854_v15, %v1816_v51  ;;  %v2061_v4 = vrot.slane %v1938_v30, 1  ;;  %v2302_v7 = vrot.slane %v2180_v26, 2 }
 0x19e   : > { %v1887_v13 = vadd.f32 %v1855_v47, %v1817_v36  ;;  %v2303_v32 = vrot.slane %v2181_v46, 2  ;;  %v2305_v48 = vrot.slane %v2182_v42, 2  ;;  %v705_v50 = vmul.f32 %v5292_v12, %v4120_v24 }
 0x19f   : > { %v2060_v31 = vsel %vm873_vm1, %v2058_v6, %v2059_v54  ;;  %v2062_v14 = vsel %vm873_vm1, %v2059_v54, %v2061_v4  ;;  %v706_v23 = vmul.f32 %v5292_v12, %v4122_v27  ;;  %v795_v21 = vmul.f32 %v3473_v57, %v4120_v24 }
 0x1a0   : > { %v2131_v10 = vadd.f32 %v2060_v31, %v1886_v3  ;;  %v2132_v40 = vadd.f32 %v2062_v14, %v1887_v13  ;;  %v2304_v22 = vsel %vm1118_vm2, %v2302_v7, %v2303_v32  ;;  %v2306_v52 = vsel %vm1118_vm2, %v2303_v32, %v2305_v48  ;;  %v5385_v31 = vld [vmem:[#allocation9_spill] sm:$0xff] }
 0x1a1   : > { %v796_v15 = vmul.f32 %v3473_v57, %v4122_v27  ;;  %v904_v33 = vrot.slane %v795_v21, 1  ;;  %v1040_v56 = vmul.f32 %v3477_v59, %v4120_v24  ;;  %v1041_v47 = vmul.f32 %v3477_v59, %v4122_v27  ;;  %v5383_v27 = vld [vmem:[#allocation6_spill] sm:$0xff] }
 0x1a2   : > { %v2375_v45 = vadd.f32 %v2304_v22, %v2131_v10  ;;  %v2376_v35 = vadd.f32 %v2306_v52, %v2132_v40  ;;  %v1281_v16 = vmul.f32 %v3489_v20, %v4300_v25  ;;  %v1282_v49 = vmul.f32 %v3489_v20, %v4302_v18 }
 0x1a3   : > { %v905_v8 = vrot.slane %v796_v15, 1  ;;  %v1149_v36 = vrot.slane %v1040_v56, 2  ;;  %v1150_v63 = vrot.slane %v1041_v47, 2  ;;  %v1356_v30 = vmul.f32 %v3479_v61, %v4300_v25  ;;  %v5389_v56 = vld [vmem:[#allocation21_spill] sm:$0xff] }
 0x1a4   : > { %v2413_v51 = vadd.f32 %v4496_v5, %v2375_v45  ;;  %v2414_v24 = vadd.f32 %v4496_v5, %v2376_v35  ;;  %v5384_v6 = vrot.slane %v5383_v27, 1  ;;  %v1357_v46 = vmul.f32 %v3479_v61, %v4302_v18 }
 0x1a5   : > { %v906_v26 = vsel %vm873_vm1, %v904_v33, %v905_v8  ;;  %v1151_v4 = vsel %vm1118_vm2, %v1149_v36, %v1150_v63  ;;  %v5386_v32 = vrot.slane %v5385_v31, 2  ;;  %v1464_v14 = vrot.slane %v1356_v30, 1 }
 0x1a6   : > { %v908_v54 = vsel %vm873_vm1, %v905_v8, %v5384_v6  ;;  %v2445_v42 = vmax.f32 %v2413_v51, 0.0  ;;  %v998_v3 = vadd.f32 %v906_v26, %v705_v50  ;;  %v2446_v7 = vmax.f32 %v2414_v24, 0.0  ;;  %v5391_v24 = vld [vmem:[#allocation11_spill] sm:$0xff] }
 0x1a7   : > { %v999_v13 = vadd.f32 %v908_v54, %v706_v23  ;;  %v1153_v48 = vsel %vm1118_vm2, %v1150_v63, %v5386_v32  ;;  %v1465_v10 = vrot.slane %v1357_v46, 1  ;;  %v1600_v22 = vmul.f32 %v3481_v62, %v4300_v25  ;;  %v5387_v23 = vld [vmem:[#allocation20_spill] sm:$0xff]  ;;  %v5390_v63 = vld [vmem:[#allocation10_spill] sm:$0xff] }
 0x1a8   : > { %v1243_v21 = vadd.f32 %v1151_v4, %v998_v3  ;;  %v1601_v52 = vmul.f32 %v3481_v62, %v4302_v18  ;;  %v2464_v15 = vpack.c.bf16 %v2446_v7, %v2445_v42  ;;  %v5388_v45 = vrot.slane %v5387_v23, 1  ;;  %v5392_v42 = vld [vmem:[#allocation12_spill] sm:$0xff] }
 0x1a9   : > { %v1244_v40 = vadd.f32 %v1153_v48, %v999_v13  ;;  %v1466_v50 = vsel %vm873_vm1, %v1464_v14, %v1465_v10  ;;  %v1711_v47 = vrot.slane %v5389_v56, 2  ;;  %v1708_v51 = vrot.slane %v1600_v22, 2 }
 0x1aa   : > { %v1468_v33 = vsel %vm873_vm1, %v1465_v10, %v5388_v45  ;;  %v1313_v35 = vadd.f32 %v1281_v16, %v1243_v21  ;;  %v1709_v36 = vrot.slane %v1601_v52, 2  ;;  %2978 = vmatmul.mubr.bf16.gmra.mrb[8].mxu1 %v2464_v15  ;;  %v1840_v30 = vmul.f32 %v3491_v29, %v5390_v63 }
 0x1ab   : > { %v1314_v8 = vadd.f32 %v1282_v49, %v1244_v40  ;;  %v1841_v26 = vmul.f32 %v3491_v29, %v5391_v24  ;;  %v1915_v27 = vmul.f32 %v3493_v0, %v5390_v63  ;;  %v1916_v6 = vmul.f32 %v3493_v0, %v5391_v24 }
 0x1ac   : > { %v1558_v54 = vadd.f32 %v1466_v50, %v1313_v35  ;;  %v1710_v16 = vsel %vm1118_vm2, %v1708_v51, %v1709_v36  ;;  %v1712_v49 = vsel %vm1118_vm2, %v1709_v36, %v1711_v47  ;;  %v1917_v3 = vmul.f32 %v3493_v0, %v5392_v42 }
 0x1ad   : > { %v1559_v46 = vadd.f32 %v1468_v33, %v1314_v8  ;;  %v2023_v13 = vrot.slane %v1915_v27, 1  ;;  %v2024_v4 = vrot.slane %v1916_v6, 1  ;;  %v2159_v7 = vmul.f32 %v4447_v9, %v5390_v63 }
 0x1ae   : > { %v1802_v31 = vadd.f32 %v1710_v16, %v1558_v54  ;;  %v2160_v48 = vmul.f32 %v4447_v9, %v5391_v24  ;;  %v2161_v14 = vmul.f32 %v4447_v9, %v5392_v42  ;;  %v2026_v21 = vrot.slane %v1917_v3, 1  ;;  %v5393_v3 = vld [vmem:[#allocation26_spill] sm:$0xff] }
 0x1af   : > { %v1803_v32 = vadd.f32 %v1712_v49, %v1559_v46  ;;  %v2025_v10 = vsel %vm873_vm1, %v2023_v13, %v2024_v4  ;;  %v2267_v40 = vrot.slane %v2159_v7, 2  ;;  %v721_v22 = vmul.f32 %v5292_v12, %v4210_v55 }
 0x1b0   : > { %v1872_v52 = vadd.f32 %v1840_v30, %v1802_v31  ;;  %v2268_v50 = vrot.slane %v2160_v48, 2  ;;  %v2270_v23 = vrot.slane %v2161_v14, 2  ;;  %v2027_v45 = vsel %vm873_vm1, %v2024_v4, %v2026_v21 }
 0x1b1   : > { %v1873_v15 = vadd.f32 %v1841_v26, %v1803_v32  ;;  %v722_v33 = vmul.f32 %v5292_v12, %v4212_v37  ;;  %v819_v56 = vmul.f32 %v3473_v57, %v4210_v55  ;;  %v820_v47 = vmul.f32 %v3473_v57, %v4212_v37 }
 0x1b2   : > { %v2117_v35 = vadd.f32 %v2025_v10, %v1872_v52  ;;  %v2269_v51 = vsel %vm1118_vm2, %v2267_v40, %v2268_v50  ;;  %v2271_v36 = vsel %vm1118_vm2, %v2268_v50, %v2270_v23  ;;  %v1064_v27 = vmul.f32 %v3477_v59, %v4210_v55  ;;  %v5395_v10 = vld [vmem:[#allocation25_spill] sm:$0xff] }
 0x1b3   : > { %v2118_v8 = vadd.f32 %v2027_v45, %v1873_v15  ;;  %v944_v30 = vrot.slane %v819_v56, 1  ;;  %v945_v26 = vrot.slane %v820_v47, 1  ;;  %v1065_v6 = vmul.f32 %v3477_v59, %v4212_v37 }
 0x1b4   : > { %v2361_v54 = vadd.f32 %v2269_v51, %v2117_v35  ;;  %v1297_v16 = vmul.f32 %v3489_v20, %v4390_v41  ;;  %v1298_v49 = vmul.f32 %v3489_v20, %v4392_v43  ;;  %v5394_v13 = vrot.slane %v5393_v3, 1 }
 0x1b5   : > { %v2362_v46 = vadd.f32 %v2271_v36, %v2118_v8  ;;  %v946_v42 = vsel %vm873_vm1, %v944_v30, %v945_v26  ;;  %v1189_v7 = vrot.slane %v1064_v27, 2  ;;  %v1190_v31 = vrot.slane %v1065_v6, 2  ;;  %v5397_v30 = vld [vmem:[#allocation41_spill] sm:$0xff]  ;;  %v5398_v6 = vld [vmem:[#allocation40_spill] sm:$0xff] }
 0x1b6   : > { %v948_v4 = vsel %vm873_vm1, %v945_v26, %v5394_v13  ;;  %v2399_v55 = vadd.f32 %v4496_v5, %v2361_v54  ;;  %v1014_v32 = vadd.f32 %v946_v42, %v721_v22  ;;  %v5396_v21 = vrot.slane %v5395_v10, 2 }
 0x1b7   : > { %v2400_v37 = vadd.f32 %v4496_v5, %v2362_v46  ;;  %v1015_v48 = vadd.f32 %v948_v4, %v722_v33  ;;  %v1191_v14 = vsel %vm1118_vm2, %v1189_v7, %v1190_v31  ;;  %v1380_v52 = vmul.f32 %v3479_v61, %v4390_v41 }
 0x1b8   : > { %v1193_v40 = vsel %vm1118_vm2, %v1190_v31, %v5396_v21  ;;  %v1381_v15 = vmul.f32 %v3479_v61, %v4392_v43  ;;  %v2431_v50 = vmax.f32 %v2399_v55, 0.0  ;;  %v1259_v45 = vadd.f32 %v1191_v14, %v1014_v32 }
 0x1b9   : > { %v2432_v23 = vmax.f32 %v2400_v37, 0.0  ;;  %v1260_v56 = vadd.f32 %v1193_v40, %v1015_v48  ;;  %v1504_v47 = vrot.slane %v1380_v52, 1  ;;  %v1624_v22 = vmul.f32 %v3481_v62, %v4390_v41 }
 0x1ba   : > { %v1505_v35 = vrot.slane %v1381_v15, 1  ;;  %v1625_v33 = vmul.f32 %v3481_v62, %v4392_v43  ;;  %v1329_v51 = vadd.f32 %v1297_v16, %v1259_v45  ;;  %v1751_v26 = vrot.slane %v5397_v30, 2 }
 0x1bb   : > { %v2457_v8 = vpack.c.bf16 %v2432_v23, %v2431_v50  ;;  %v1330_v36 = vadd.f32 %v1298_v49, %v1260_v56  ;;  %v5399_v54 = vrot.slane %v5398_v6, 1  ;;  %v1748_v42 = vrot.slane %v1624_v22, 2  ;;  %v5400_v56 = vld [vmem:[#allocation31_spill] sm:$0xff] }
 0x1bc   : > { %v1506_v27 = vsel %vm873_vm1, %v1504_v47, %v1505_v35  ;;  %v1749_v3 = vrot.slane %v1625_v33, 2  ;;  %v1856_v41 = vmul.f32 %v3491_v29, %v4479_v60  ;;  %v1857_v43 = vmul.f32 %v3491_v29, %v4481_v34  ;;  %v5402_v33 = vld [vmem:[#allocation39_spill] sm:$0xff] }
 0x1bd   : > { %v1508_v46 = vsel %vm873_vm1, %v1505_v35, %v5399_v54  ;;  %2965 = vmatprep.mubr.bf16.mxu0 %v2457_v8  ;;  %v1574_v13 = vadd.f32 %v1506_v27, %v1329_v51  ;;  %v1939_v7 = vmul.f32 %v3493_v0, %v4479_v60  ;;  %v1940_v31 = vmul.f32 %v3493_v0, %v4481_v34 }
 0x1be   : > { %v1575_v4 = vadd.f32 %v1508_v46, %v1330_v36  ;;  %v1750_v16 = vsel %vm1118_vm2, %v1748_v42, %v1749_v3  ;;  %v1752_v49 = vsel %vm1118_vm2, %v1749_v3, %v1751_v26  ;;  %v2183_v32 = vmul.f32 %v4447_v9, %v4479_v60 }
 0x1bf   : > { %v1818_v55 = vadd.f32 %v1750_v16, %v1574_v13  ;;  %v2184_v48 = vmul.f32 %v4447_v9, %v4481_v34  ;;  %v2063_v14 = vrot.slane %v1939_v7, 1  ;;  %v2064_v10 = vrot.slane %v1940_v31, 1  ;;  %v5404_v13 = vld [vmem:[#allocation7_spill] sm:$0xff] }
 0x1c0   : > { %v1819_v37 = vadd.f32 %v1752_v49, %v1575_v4  ;;  %v707_v21 = vmul.f32 %v5292_v12, %v4300_v25  ;;  %v708_v40 = vmul.f32 %v5292_v12, %v4302_v18  ;;  %v2307_v50 = vrot.slane %v2183_v32, 2 }
 0x1c1   : > { %v1888_v52 = vadd.f32 %v1856_v41, %v1818_v55  ;;  %v2308_v23 = vrot.slane %v2184_v48, 2  ;;  %v2065_v45 = vsel %vm873_vm1, %v2063_v14, %v2064_v10  ;;  %v5401_v47 = vrot.slane %v5400_v56, 1  ;;  %v5406_v55 = vld [vmem:[#allocation8_spill] sm:$0xff] }
 0x1c2   : > { %v1889_v15 = vadd.f32 %v1857_v43, %v1819_v37  ;;  %v798_v9 = vmul.f32 %v3473_v57, %v4300_v25  ;;  %v799_v34 = vmul.f32 %v3473_v57, %v4302_v18  ;;  %v5403_v8 = vrot.slane %v5402_v33, 2  ;;  %v4944_v42 = vpop.f32.mrb[0].mxu0 }
 0x1c3   : > { %v2067_v60 = vsel %vm873_vm1, %v2064_v10, %v5401_v47  ;;  %v2133_v35 = vadd.f32 %v2065_v45, %v1888_v52  ;;  %v2309_v12 = vsel %vm1118_vm2, %v2307_v50, %v2308_v23  ;;  %v1043_v26 = vmul.f32 %v3477_v59, %v4300_v25  ;;  %v4950_v16 = vpop.f32.mrb[1].mxu0 }
 0x1c4   : > { %v2134_v22 = vadd.f32 %v2067_v60, %v1889_v15  ;;  %v2311_v51 = vsel %vm1118_vm2, %v2308_v23, %v5403_v8  ;;  %v909_v36 = vrot.slane %v798_v9, 1  ;;  %v910_v30 = vrot.slane %v799_v34, 1  ;;  %v4954_v31 = vpop.f32.mrb[2].mxu0  ;;  %v5408_v9 = vld [vmem:[#allocation14_spill] sm:$0xff] }
 0x1c5   : > { %v1044_v27 = vmul.f32 %v3477_v59, %v4302_v18  ;;  %v2377_v6 = vadd.f32 %v2309_v12, %v2133_v35  ;;  %v1283_v57 = vmul.f32 %v3489_v20, %v5390_v63  ;;  %v1284_v46 = vmul.f32 %v3489_v20, %v5391_v24  ;;  %v4964_v10 = vpop.f32.mrb[3].mxu0  ;;  %v5409_v35 = vld [vmem:[#allocation13_spill] sm:$0xff] }
 0x1c6   : > { %v2378_v54 = vadd.f32 %v2311_v51, %v2134_v22  ;;  %v911_v3 = vsel %vm873_vm1, %v909_v36, %v910_v30  ;;  %v5405_v4 = vrot.slane %v5404_v13, 1  ;;  %v1154_v25 = vrot.slane %v1043_v26, 2 }
 0x1c7   : > { %v1155_v43 = vrot.slane %v1044_v27, 2  ;;  %v2415_v59 = vadd.f32 %v4496_v5, %v2377_v6  ;;  %v1000_v49 = vadd.f32 %v911_v3, %v707_v21  ;;  %v5407_v37 = vrot.slane %v5406_v55, 2  ;;  %v5413_v3 = vld [vmem:[#allocation15_spill] sm:$0xff] }
 0x1c8   : > { %v913_v41 = vsel %vm873_vm1, %v910_v30, %v5405_v4  ;;  %v2416_v18 = vadd.f32 %v4496_v5, %v2378_v54  ;;  %v1359_v48 = vmul.f32 %v3479_v61, %v5390_v63  ;;  %v1360_v14 = vmul.f32 %v3479_v61, %v5391_v24  ;;  %v3116_v4 = vld [vmem:[%s5158_s1 + $0x8] ss:$0 sm:$0xff] }
 0x1c9   : > { %v1001_v7 = vadd.f32 %v913_v41, %v708_v40  ;;  %v1156_v20 = vsel %vm1118_vm2, %v1154_v25, %v1155_v43  ;;  %v1158_v32 = vsel %vm1118_vm2, %v1155_v43, %v5407_v37  ;;  %v2447_v52 = vmax.f32 %v2415_v59, 0.0 }
 0x1ca   : > { %v2448_v5 = vmax.f32 %v2416_v18, 0.0  ;;  %v1245_v21 = vadd.f32 %v1156_v20, %v1000_v49  ;;  %v1469_v15 = vrot.slane %v1359_v48, 1  ;;  %v1470_v50 = vrot.slane %v1360_v14, 1  ;;  %v5003_v48 = vld [vmem:[%s5161_s4] ss:$0 sm:$0xff] }
 0x1cb   : > { %v1246_v40 = vadd.f32 %v1158_v32, %v1001_v7  ;;  %v1603_v23 = vmul.f32 %v3481_v62, %v5390_v63  ;;  %v1604_v45 = vmul.f32 %v3481_v62, %v5391_v24  ;;  %v1716_v34 = vrot.slane %v5408_v9, 2  ;;  %v5411_v63 = vld [vmem:[#allocation16_spill] sm:$0xff]  ;;  %v5412_v24 = vld [vmem:[#allocation17_spill] sm:$0xff] }
 0x1cc   : > { %v2465_v56 = vpack.c.bf16 %v2448_v5, %v2447_v52  ;;  %v1315_v47 = vadd.f32 %v1283_v57, %v1245_v21  ;;  %v1471_v61 = vsel %vm873_vm1, %v1469_v15, %v1470_v50  ;;  %v5410_v22 = vrot.slane %v5409_v35, 1 }
 0x1cd   : > { %v1316_v60 = vadd.f32 %v1284_v46, %v1246_v40  ;;  %v1713_v33 = vrot.slane %v1603_v23, 2  ;;  %v1714_v8 = vrot.slane %v1604_v45, 2  ;;  %v1842_v62 = vmul.f32 %v3491_v29, %v5411_v63 }
 0x1ce   : > { %v1473_v12 = vsel %vm873_vm1, %v1470_v50, %v5410_v22  ;;  %2981 = vmatprep.mubr.bf16.mxu1 %v2465_v56  ;;  %v1560_v51 = vadd.f32 %v1471_v61, %v1315_v47  ;;  %v1843_v30 = vmul.f32 %v3491_v29, %v5412_v24  ;;  %v1918_v6 = vmul.f32 %v3493_v0, %v5411_v63 }
 0x1cf   : > { %v1561_v36 = vadd.f32 %v1473_v12, %v1316_v60  ;;  %v1715_v26 = vsel %vm1118_vm2, %v1713_v33, %v1714_v8  ;;  %v1717_v27 = vsel %vm1118_vm2, %v1714_v8, %v1716_v34  ;;  %v1919_v54 = vmul.f32 %v3493_v0, %v5412_v24 }
 0x1d0   : > { %v1804_v57 = vadd.f32 %v1715_v26, %v1560_v51  ;;  %v1920_v13 = vmul.f32 %v3493_v0, %v5413_v3  ;;  %v2162_v29 = vmul.f32 %v3116_v4, %v5411_v63  ;;  %v2028_v41 = vrot.slane %v1918_v6, 1 }
 0x1d1   : > { %v1805_v46 = vadd.f32 %v1717_v27, %v1561_v36  ;;  %v2029_v25 = vrot.slane %v1919_v54, 1  ;;  %v2163_v43 = vmul.f32 %v3116_v4, %v5412_v24  ;;  %v2164_v59 = vmul.f32 %v3116_v4, %v5413_v3 }
 0x1d2   : > { %v1874_v18 = vadd.f32 %v1842_v62, %v1804_v57  ;;  %v2031_v7 = vrot.slane %v1920_v13, 1  ;;  %v2272_v20 = vrot.slane %v2162_v29, 2  ;;  %v2070_v32 = vsel %vm873_vm1, %v2068_v38, %v2069_v44 }
 0x1d3   : > { %v1875_v49 = vadd.f32 %v1843_v30, %v1805_v46  ;;  %v2030_v0 = vsel %vm873_vm1, %v2028_v41, %v2029_v25  ;;  %v2273_v55 = vrot.slane %v2163_v43, 2  ;;  %v2275_v37 = vrot.slane %v2164_v59, 2 }
 0x1d4   : > { %v2032_v14 = vsel %vm873_vm1, %v2029_v25, %v2031_v7  ;;  %v2119_v52 = vadd.f32 %v2030_v0, %v1874_v18  ;;  %v2072_v5 = vsel %vm873_vm1, %v2069_v44, %v2071_v11  ;;  %v2135_v21 = vadd.f32 %v2070_v32, %v4688_v53 }
 0x1d5   : > { %v2120_v58 = vadd.f32 %v2032_v14, %v1875_v49  ;;  %v2274_v38 = vsel %vm1118_vm2, %v2272_v20, %v2273_v55  ;;  %v2276_v40 = vsel %vm1118_vm2, %v2273_v55, %v2275_v37  ;;  %v2136_v15 = vadd.f32 %v2072_v5, %v4690_v39  ;;  %v2971_v36 = vpop.f32.mrb[0].mxu1 }
 0x1d6   : > { %v2363_v50 = vadd.f32 %v2274_v38, %v2119_v52  ;;  %v5414_v23 = vrot.slane %v4678_v17, 2  ;;  %v5415_v2 = vrot.slane %v4675_v19, 2  ;;  %v5416_v11 = vrot.slane %v4622_v28, 2  ;;  %v3117_v19 = vld [vmem:[%s5159_s2] ss:$0 sm:$0xff]  ;;  %v2636_v63 = vpop.f32.mrb[1].mxu1 }
 0x1d7   : > { %v2581_v45 = vadd.f32 %v4944_v42, %v5003_v48  ;;  %v2364_v56 = vadd.f32 %v2276_v40, %v2120_v58  ;;  %v2573_v39 = vadd.f32 %v5003_v48, %v4950_v16  ;;  %v2584_v28 = vadd.f32 %v4954_v31, %v5003_v48  ;;  %v2972_v26 = vpop.f32.mrb[2].mxu1 }
 0x1d8   : > { %v2314_v1 = vsel %vm1118_vm2, %v5415_v2, %v5414_v23  ;;  %v5417_v44 = vmov %v5414_v23  ;;  %v2401_v9 = vadd.f32 %v3117_v19, %v2363_v50  ;;  %v2576_v17 = vadd.f32 %v5003_v48, %v4964_v10  ;;  %v2639_v54 = vpop.f32.mrb[3].mxu1 }
 0x1d9   : > { %v2316_v53 = vsel %vm1118_vm2, %v5417_v44, %v5416_v11  ;;  %v2379_v47 = vadd.f32 %v2314_v1, %v2135_v21  ;;  %v2701_v34 = vmax.f32 %v2581_v45, 0.0  ;;  %v2402_v61 = vadd.f32 %v3117_v19, %v2364_v56 }
 0x1da   : > { %v2380_v60 = vadd.f32 %v2316_v53, %v2136_v15  ;;  %v2699_v22 = vmax.f32 %v2573_v39, 0.0  ;;  %v2433_v12 = vmax.f32 %v2401_v9, 0.0  ;;  %v2702_v16 = vmax.f32 %v2584_v28, 0.0 }
 0x1db   : > { %v2417_v42 = vadd.f32 %v3117_v19, %v2379_v47  ;;  %2733 = vst [vmem:[%s5038_s24 + $0x10] sm:$0xff] %v2701_v34  ;;  %v2700_v33 = vmax.f32 %v2576_v17, 0.0  ;;  %v2434_v8 = vmax.f32 %v2402_v61, 0.0  ;;  %v2645_v10 = vadd.f32 %v2971_v36, %v5003_v48 }
 0x1dc   : > { %v2418_v35 = vadd.f32 %v3117_v19, %v2380_v60  ;;  %2731 = vst [vmem:[%s5038_s24] sm:$0xff] %v2699_v22  ;;  %2734 = vst [vmem:[%s5038_s24 + $0x18] sm:$0xff] %v2702_v16  ;;  %v2637_v30 = vadd.f32 %v5003_v48, %v2636_v63  ;;  %v2648_v6 = vadd.f32 %v2972_v26, %v5003_v48 }
 0x1dd   : > { %v2449_v51 = vmax.f32 %v2417_v42, 0.0  ;;  %2732 = vst [vmem:[%s5038_s24 + $0x8] sm:$0xff] %v2700_v33  ;;  %v2458_v62 = vpack.c.bf16 %v2434_v8, %v2433_v12  ;;  %v2717_v27 = vmax.f32 %v2645_v10, 0.0  ;;  %v2640_v46 = vadd.f32 %v5003_v48, %v2639_v54 }
 0x1de   : > { %v2450_v31 = vmax.f32 %v2418_v35, 0.0  ;;  %v2715_v57 = vmax.f32 %v2637_v30, 0.0  ;;  %v2718_v3 = vmax.f32 %v2648_v6, 0.0 }
 0x1df   : > { %2966 = vmatmul.mubr.bf16.gmra.mrb[12].mxu0 %v2458_v62  ;;  %2749 = vst [vmem:[%s5038_s24 + $0x90] sm:$0xff] %v2717_v27  ;;  %v2716_v13 = vmax.f32 %v2640_v46, 0.0 }
 0x1e0   : > { %v2466_v24 = vpack.c.bf16 %v2450_v31, %v2449_v51  ;;  %2747 = vst [vmem:[%s5038_s24 + $0x80] sm:$0xff] %v2715_v57  ;;  %2750 = vst [vmem:[%s5038_s24 + $0x98] sm:$0xff] %v2718_v3 }
 0x1e1   : > { %2748 = vst [vmem:[%s5038_s24 + $0x88] sm:$0xff] %v2716_v13 }
 0x1e2   : > { %2982 = vmatmul.mubr.bf16.gmra.mrb[12].mxu1 %v2466_v24 }
 0x213   : > { %v2959_v4 = vpop.f32.mrb[4].mxu0 }
 0x214   : > { %v2597_v29 = vadd.f32 %v2959_v4, %v5003_v48  ;;  %v2588_v41 = vpop.f32.mrb[5].mxu0 }
 0x215   : > { %v2589_v25 = vadd.f32 %v5003_v48, %v2588_v41  ;;  %v2960_v43 = vpop.f32.mrb[6].mxu0 }
 0x216   : > { %v2705_v59 = vmax.f32 %v2597_v29, 0.0  ;;  %v2600_v18 = vadd.f32 %v2960_v43, %v5003_v48  ;;  %v2591_v49 = vpop.f32.mrb[7].mxu0 }
 0x217   : > { %v2703_v7 = vmax.f32 %v2589_v25, 0.0  ;;  %v2592_v20 = vadd.f32 %v5003_v48, %v2591_v49 }
 0x218   : > { %2737 = vst [vmem:[%s5038_s24 + $0x30] sm:$0xff] %v2705_v59  ;;  %v2706_v0 = vmax.f32 %v2600_v18, 0.0 }
 0x219   : > { %2735 = vst [vmem:[%s5038_s24 + $0x20] sm:$0xff] %v2703_v7  ;;  %v2704_v55 = vmax.f32 %v2592_v20, 0.0 }
 0x21a   : > { %2738 = vst [vmem:[%s5038_s24 + $0x38] sm:$0xff] %v2706_v0 }
 0x21b   : > { %2736 = vst [vmem:[%s5038_s24 + $0x28] sm:$0xff] %v2704_v55 }
 0x227   : > { %v2975_v37 = vpop.f32.mrb[4].mxu1 }
 0x228   : > { %v2661_v32 = vadd.f32 %v2975_v37, %v5003_v48  ;;  %v2652_v14 = vpop.f32.mrb[5].mxu1 }
 0x229   : > { %v2653_v52 = vadd.f32 %v5003_v48, %v2652_v14  ;;  %v2976_v5 = vpop.f32.mrb[6].mxu1 }
 0x22a   : > { %v2721_v21 = vmax.f32 %v2661_v32, 0.0  ;;  %v2664_v58 = vadd.f32 %v2976_v5, %v5003_v48  ;;  %v2655_v38 = vpop.f32.mrb[7].mxu1 }
 0x22b   : > { %v2719_v40 = vmax.f32 %v2653_v52, 0.0  ;;  %v2656_v15 = vadd.f32 %v5003_v48, %v2655_v38 }
 0x22c   : > { %2753 = vst [vmem:[%s5038_s24 + $0xb0] sm:$0xff] %v2721_v21  ;;  %v2722_v50 = vmax.f32 %v2664_v58, 0.0 }
 0x22d   : > { %2751 = vst [vmem:[%s5038_s24 + $0xa0] sm:$0xff] %v2719_v40  ;;  %v2720_v23 = vmax.f32 %v2656_v15, 0.0 }
 0x22e   : > { %2754 = vst [vmem:[%s5038_s24 + $0xb8] sm:$0xff] %v2722_v50 }
 0x22f   : > { %2752 = vst [vmem:[%s5038_s24 + $0xa8] sm:$0xff] %v2720_v23 }
 0x26f   : > { %v2963_v2 = vpop.f32.mrb[8].mxu0 }
 0x270   : > { %v2613_v1 = vadd.f32 %v2963_v2, %v5003_v48  ;;  %v2604_v11 = vpop.f32.mrb[9].mxu0 }
 0x271   : > { %v2605_v44 = vadd.f32 %v5003_v48, %v2604_v11  ;;  %v2964_v53 = vpop.f32.mrb[10].mxu0 }
 0x272   : > { %v2709_v45 = vmax.f32 %v2613_v1, 0.0  ;;  %v2616_v56 = vadd.f32 %v2964_v53, %v5003_v48  ;;  %v2607_v47 = vpop.f32.mrb[11].mxu0 }
 0x273   : > { %v2707_v60 = vmax.f32 %v2605_v44, 0.0  ;;  %v2608_v39 = vadd.f32 %v5003_v48, %v2607_v47 }
 0x274   : > { %2741 = vst [vmem:[%s5038_s24 + $0x50] sm:$0xff] %v2709_v45  ;;  %v2710_v19 = vmax.f32 %v2616_v56, 0.0 }
 0x275   : > { %2739 = vst [vmem:[%s5038_s24 + $0x40] sm:$0xff] %v2707_v60  ;;  %v2708_v9 = vmax.f32 %v2608_v39, 0.0 }
 0x276   : > { %2742 = vst [vmem:[%s5038_s24 + $0x58] sm:$0xff] %v2710_v19 }
 0x277   : > { %2740 = vst [vmem:[%s5038_s24 + $0x48] sm:$0xff] %v2708_v9 }
 0x27d   : > { %v2979_v34 = vpop.f32.mrb[8].mxu1 }
 0x27e   : > { %v2677_v28 = vadd.f32 %v2979_v34, %v5003_v48  ;;  %v2668_v17 = vpop.f32.mrb[9].mxu1 }
 0x27f   : > { %v2669_v61 = vadd.f32 %v5003_v48, %v2668_v17  ;;  %v2980_v42 = vpop.f32.mrb[10].mxu1 }
 0x280   : > { %v2725_v35 = vmax.f32 %v2677_v28, 0.0  ;;  %v2680_v22 = vadd.f32 %v2980_v42, %v5003_v48  ;;  %v2671_v12 = vpop.f32.mrb[11].mxu1 }
 0x281   : > { %v2723_v16 = vmax.f32 %v2669_v61, 0.0  ;;  %v2672_v33 = vadd.f32 %v5003_v48, %v2671_v12 }
 0x282   : > { %2757 = vst [vmem:[%s5038_s24 + $0xd0] sm:$0xff] %v2725_v35  ;;  %v2726_v8 = vmax.f32 %v2680_v22, 0.0 }
 0x283   : > { %2755 = vst [vmem:[%s5038_s24 + $0xc0] sm:$0xff] %v2723_v16  ;;  %v2724_v51 = vmax.f32 %v2672_v33, 0.0 }
 0x284   : > { %2758 = vst [vmem:[%s5038_s24 + $0xd8] sm:$0xff] %v2726_v8 }
 0x285   : > { %2756 = vst [vmem:[%s5038_s24 + $0xc8] sm:$0xff] %v2724_v51 }
 0x2b2   : > { %v2967_v31 = vpop.f32.mrb[12].mxu0 }
 0x2b3   : > { %v2629_v10 = vadd.f32 %v2967_v31, %v5003_v48  ;;  %v2620_v63 = vpop.f32.mrb[13].mxu0 }
 0x2b4   : > { %v2621_v30 = vadd.f32 %v5003_v48, %v2620_v63  ;;  %v2968_v26 = vpop.f32.mrb[14].mxu0 }
 0x2b5   : > { %v2983_v36 = vpop.f32.mrb[12].mxu1  ;;  %v2713_v54 = vmax.f32 %v2629_v10, 0.0  ;;  %v2632_v57 = vadd.f32 %v2968_v26, %v5003_v48  ;;  %v2623_v46 = vpop.f32.mrb[15].mxu0 }
 0x2b6   : > { %v2693_v62 = vadd.f32 %v2983_v36, %v5003_v48  ;;  %v2684_v24 = vpop.f32.mrb[13].mxu1  ;;  %v2711_v29 = vmax.f32 %v2621_v30, 0.0  ;;  %v2624_v41 = vadd.f32 %v5003_v48, %v2623_v46 }
 0x2b7   : > { %v2685_v27 = vadd.f32 %v5003_v48, %v2684_v24  ;;  %v2984_v6 = vpop.f32.mrb[14].mxu1  ;;  %2745 = vst [vmem:[%s5038_s24 + $0x70] sm:$0xff] %v2713_v54  ;;  %v2714_v59 = vmax.f32 %v2632_v57, 0.0 }
 0x2b8   : > { %v2729_v3 = vmax.f32 %v2693_v62, 0.0  ;;  %v2696_v13 = vadd.f32 %v2984_v6, %v5003_v48  ;;  %v2687_v4 = vpop.f32.mrb[15].mxu1  ;;  %2743 = vst [vmem:[%s5038_s24 + $0x60] sm:$0xff] %v2711_v29  ;;  %v2712_v49 = vmax.f32 %v2624_v41, 0.0 }
 0x2b9   : > { %v2727_v25 = vmax.f32 %v2685_v27, 0.0  ;;  %v2688_v43 = vadd.f32 %v5003_v48, %v2687_v4  ;;  %2746 = vst [vmem:[%s5038_s24 + $0x78] sm:$0xff] %v2714_v59 }
 0x2ba   : > { %2761 = vst [vmem:[%s5038_s24 + $0xf0] sm:$0xff] %v2729_v3  ;;  %v2730_v18 = vmax.f32 %v2696_v13, 0.0  ;;  %2744 = vst [vmem:[%s5038_s24 + $0x68] sm:$0xff] %v2712_v49 }
 0x2bb   : > { %2759 = vst [vmem:[%s5038_s24 + $0xe0] sm:$0xff] %v2727_v25  ;;  %v2728_v7 = vmax.f32 %v2688_v43, 0.0 }
 0x2bc   : > { %2762 = vst [vmem:[%s5038_s24 + $0xf8] sm:$0xff] %v2730_v18 }
 0x2bd   : > { %2760 = vst [vmem:[%s5038_s24 + $0xe8] sm:$0xff] %v2728_v7 }
 0x2be   : > { %3131 = shalt.err (!%p3128_p5)
}
 0x2bf   : > { %s3132_s13 = scalar_lea.hbm %s5099_s7, 4096  ;;  %s3136_s17 = scalar_lea.hbm %s5162_s5, 8192 }
 0x2c0   : > { %p3133_p6 = scmp.ne.s32.totalorder %s5099_s7, %s3132_s13  ;;  %p3137_p10 = scmp.lt.u32.totalorder %s5099_s7, %s5162_s5 }
 0x2c1   : > { %p3138_p11 = scmp.lt.u32.totalorder %s3136_s17, %s3132_s13  ;;  %p3140_p13 = scmp.lt.u32.totalorder %s3132_s13, %s5099_s7 }
 0x2c2   : > { %p3134_p7 = pnand %p3133_p6, %p3272_p4 }
 0x2c3   : > { %p3139_p12 = por %p3138_p11, %p3137_p10 }
 0x2c4   : > { %p3135_p9 = pneg %p3134_p7 }
 0x2c5   : > { %p3141_p0 = por %p3140_p13, %p3139_p12 }
 0x2c7   : > { %p3142_p1 = pnand %p3141_p0, %p3135_p9 }
 0x2c9   : > { %3145 = shalt.err (!%p3142_p1)
}
 0x2ca   : > { %s3200_s25 = smov 128   ;;  %s3201_s21 = smov 8  }
 0x2cb   : > { %3002 = dma.vmem_to_hbm [thread:$0]  (%p3272_p4), %s5101_s27, 4096, %s5099_s7, %s5111_s8, %s3200_s25, %s3200_s25, %s3201_s21  }
 0x2cc PF: > { %p3008_p2 = scmp.ge.s32.totalorder %s3196_s23, 2  ;;  %s2795_s29 = sand.u32 1, %s3176_s18  }
 0x2cd   : > { %s2796_s9 = scalar_lea.sflag [#allocation3], %s2795_s29 }
 0x2ce   : > { %p3005_p3 = pnand %p3008_p2, %p3279_p8 }
 0x2d0   : > { %3171 = dma.done.wait (!%p3005_p3), %s2796_s9, 4096  }
 0x2d1   : > { %3173 = vsyncadd (!%p3005_p3), %s2796_s9, 4294963200  ;;  %s18_s23 = sadd.s32 1, %s3196_s23   ;;  %s5418_s18 = smov %s3180_s19 }
 0x2d2   : > { %p15_p5 = scmp.ge.s32.totalorder %s18_s23, 4   ;;  %s5419_s19 = smov %s3184_s20 }
 0x2d3   : > { %s5420_s20 = smov %s3285_s6  ;;  %s5421_s21 = smov %s3192_s22 }
 0x2d4   : > { %s5422_s22 = smov %s5424_s26  ;;  %17 = sbr.rel (!%p15_p5) target bundleno = 4 (0x4), region = 75 }
 0x2db   :  { %2801 = vsyncpa [#allocation3], 1 }
 0x2dc   :  { %2803 = vsyncpa [#allocation3 + $0x1], 1 }

</bundles_post_ra>
